<compile_context>
chip_gen: v7x
topology: tpu7x:2x2x1
jax: 0.10.0
libtpu: 0.0.40
codegen_flags: <defaults>
</compile_context>

<pallas_src>
import jax
import jax.numpy as jnp
from jax.experimental import pallas as pl
from jax.experimental.pallas import tpu as pltpu

HIDDEN = 4096  # fixed by the module (nn.Linear(txt_feat_len, 4096))


def txtnet_kernel(x_ref, w1t_ref, b1_ref, w2t_ref, b2_ref, alpha_ref,
                  feat_ref, hid_ref, code_ref):
    # fc1: (B, F) @ (F, H) + b1, then ReLU.  Operands in the weights' dtype
    # (bf16 by default) on the MXU, f32 accumulation.
    xb = x_ref[...].astype(w1t_ref.dtype)
    feat = jnp.dot(xb, w1t_ref[...], preferred_element_type=jnp.float32)
    feat = jnp.maximum(feat + b1_ref[...], 0.0)
    feat_ref[...] = feat.astype(feat_ref.dtype)

    # fc2: (B, H) @ (H, C) + b2.
    hid = jnp.dot(feat.astype(w2t_ref.dtype), w2t_ref[...],
                  preferred_element_type=jnp.float32) + b2_ref[...]
    hid_ref[...] = hid.astype(hid_ref.dtype)

    # tanh(alpha * hid) with alpha read from SMEM at runtime (no recompile
    # when alpha anneals).
    alpha = alpha_ref[0]
    code_ref[...] = jnp.tanh(alpha * hid).astype(code_ref.dtype)


def prepare_params(w1, b1, w2, b2, weights_dtype=jnp.bfloat16):
    """One-time (model-init) parameter prep: transpose + dtype cast.

    w1: (4096, txt_feat_len), b1: (4096,), w2: (code_len, 4096), b2: (code_len,)
    (PyTorch nn.Linear layout).  Do NOT call this per forward pass.
    Use weights_dtype=jnp.float32 for exact fidelity to the f32 PyTorch module.
    """
    H, F = w1.shape
    C = w2.shape[0]
    return {
        "w1t": jnp.asarray(w1, weights_dtype).T,                  # (F, H)
        "b1": jnp.asarray(b1, jnp.float32).reshape(1, H),         # (1, H)
        "w2t": jnp.asarray(w2, weights_dtype).T,                  # (H, C) unpadded
        "b2": jnp.asarray(b2, jnp.float32).reshape(1, C),         # (1, C)
    }


def txtnet_forward(x, params, alpha=1.0):
    """x: (B, txt_feat_len) f32; params from prepare_params; alpha: scalar
    (Python float or traced).  Returns (feat, hid, code) like TxtNet.forward."""
    B, F = x.shape
    w1t, b1 = params["w1t"], params["b1"]
    w2t, b2 = params["w2t"], params["b2"]
    H = w1t.shape[1]
    C = w2t.shape[1]
    assert w1t.shape[0] == F and H == HIDDEN

    alpha_arr = jnp.asarray(alpha, jnp.float32).reshape((1,))

    feat, hid, code = pl.pallas_call(
        txtnet_kernel,
        out_shape=(
            jax.ShapeDtypeStruct((B, H), jnp.float32),   # feat
            jax.ShapeDtypeStruct((B, C), jnp.float32),   # hid
            jax.ShapeDtypeStruct((B, C), jnp.float32),   # code
        ),
        grid_spec=pltpu.PrefetchScalarGridSpec(
            num_scalar_prefetch=0,
            grid=(1,),                                   # single step (per review)
            in_specs=[
                pl.BlockSpec((B, F), lambda i: (0, 0)),            # x (whole)
                pl.BlockSpec((F, H), lambda i: (0, 0)),            # W1^T (whole)
                pl.BlockSpec((1, H), lambda i: (0, 0)),            # b1
                pl.BlockSpec((H, C), lambda i: (0, 0)),            # W2^T (unpadded)
                pl.BlockSpec((1, C), lambda i: (0, 0)),            # b2
                pl.BlockSpec(memory_space=pltpu.MemorySpace.SMEM),  # alpha (runtime scalar)
            ],
            out_specs=[
                pl.BlockSpec((B, H), lambda i: (0, 0)),            # feat
                pl.BlockSpec((B, C), lambda i: (0, 0)),            # hid
                pl.BlockSpec((B, C), lambda i: (0, 0)),            # code
            ],
        ),
        compiler_params=pltpu.CompilerParams(
            dimension_semantics=("arbitrary",)),
    )(x, w1t, b1, w2t, b2, alpha_arr)

    return feat, hid, code


if __name__ == "__main__":
    # Small shapes consistent with the forward: batch=8, txt_feat_len=128, code_len=64
    B, F, C = 8, 128, 64
    key = jax.random.PRNGKey(0)
    kx, kw1, kb1, kw2, kb2 = jax.random.split(key, 5)

    x = jax.random.normal(kx, (B, F), dtype=jnp.float32)
    # PyTorch-Linear-style shapes: (out, in)
    w1 = jax.random.normal(kw1, (HIDDEN, F), dtype=jnp.float32) * (1.0 / jnp.sqrt(F))
    b1 = jax.random.normal(kb1, (HIDDEN,), dtype=jnp.float32) * 0.01
    w2 = jax.random.normal(kw2, (C, HIDDEN), dtype=jnp.float32) * (1.0 / jnp.sqrt(HIDDEN))
    b2 = jax.random.normal(kb2, (C,), dtype=jnp.float32) * 0.01

    params = prepare_params(w1, b1, w2, b2)          # one-time init-style prep

    # Forward with alpha = 1.0.
    feat, hid, code = txtnet_forward(x, params, alpha=1.0)
    jax.block_until_ready((feat, hid, code))

    # Anneal alpha (TxtNet.set_alpha): same compiled kernel, new runtime scalar.
    alpha2 = 2.0 ** 0.5
    feat2, hid2, code2 = txtnet_forward(x, params, alpha=alpha2)
    jax.block_until_ready((feat2, hid2, code2))

    assert feat.shape == (B, HIDDEN) and hid.shape == (B, C) and code.shape == (B, C)

    # Tight reference: same bf16-quantized operands the kernel streams, so the
    # only differences are accumulation-order rounding.
    w1q = w1.astype(jnp.bfloat16).astype(jnp.float32)
    w2q = w2.astype(jnp.bfloat16).astype(jnp.float32)
    xq = x.astype(jnp.bfloat16).astype(jnp.float32)
    feat_want = jnp.maximum(xq @ w1q.T + b1, 0.0)
    hid_want = feat_want.astype(jnp.bfloat16).astype(jnp.float32) @ w2q.T + b2
    code_want = jnp.tanh(1.0 * hid_want)

    assert jnp.allclose(feat, feat_want, atol=2e-3, rtol=2e-3)
    assert jnp.allclose(hid, hid_want, atol=2e-3, rtol=2e-3)
    assert jnp.allclose(code, code_want, atol=2e-3, rtol=2e-3)

    # Document/bound the bf16-weight divergence from the TRUE f32 PyTorch
    # module (loose check; use prepare_params(..., weights_dtype=jnp.float32)
    # if exact f32 fidelity is required).
    feat_f32 = jnp.maximum(x @ w1.T + b1, 0.0)
    hid_f32 = feat_f32 @ w2.T + b2
    code_f32 = jnp.tanh(1.0 * hid_f32)
    assert jnp.allclose(feat, feat_f32, atol=1e-1, rtol=1e-1)
    assert jnp.allclose(hid, hid_f32, atol=1e-1, rtol=1e-1)
    assert jnp.allclose(code, code_f32, atol=1e-1, rtol=1e-1)

    # The annealed-alpha call must reuse hid and apply tanh(alpha2 * hid).
    assert jnp.allclose(hid2, hid, atol=1e-5, rtol=1e-5)
    assert jnp.allclose(code2, jnp.tanh(alpha2 * hid), atol=2e-3, rtol=2e-3)

    print("KERNEL_OK")
</pallas_src>

<mosaic_0001>
module attributes {stable_mosaic.version = 11 : i64} {
  func.func @txtnet_kernel(%arg0: i32, %arg1: memref<8x128xf32, #tpu.memory_space<vmem>>, %arg2: memref<128x4096xbf16, #tpu.memory_space<vmem>>, %arg3: memref<1x4096xf32, #tpu.memory_space<vmem>>, %arg4: memref<4096x64xbf16, #tpu.memory_space<vmem>>, %arg5: memref<1x64xf32, #tpu.memory_space<vmem>>, %arg6: memref<1xf32, #tpu.memory_space<smem>>, %arg7: memref<8x4096xf32, #tpu.memory_space<vmem>>, %arg8: memref<8x64xf32, #tpu.memory_space<vmem>>, %arg9: memref<8x64xf32, #tpu.memory_space<vmem>>) attributes {dimension_semantics = [#tpu.dimension_semantics<arbitrary>], iteration_bounds = array<i64: 1>, scalar_prefetch = 0 : i64, scratch_operands = 0 : i64, tpu.core_type = #tpu.core_type<tc>, window_params = [{pipeline_mode = #tpu.pipeline_mode<synchronous>, transform_indices = @transform_0, window_bounds = array<i64: 8, 128>}, {pipeline_mode = #tpu.pipeline_mode<synchronous>, transform_indices = @transform_1, window_bounds = array<i64: 128, 4096>}, {pipeline_mode = #tpu.pipeline_mode<synchronous>, transform_indices = @transform_2, window_bounds = array<i64: 1, 4096>}, {pipeline_mode = #tpu.pipeline_mode<synchronous>, transform_indices = @transform_3, window_bounds = array<i64: 4096, 64>}, {pipeline_mode = #tpu.pipeline_mode<synchronous>, transform_indices = @transform_4, window_bounds = array<i64: 1, 64>}, {transform_indices = @transform_5, window_bounds = array<i64: 1>}, {pipeline_mode = #tpu.pipeline_mode<synchronous>, transform_indices = @transform_6, window_bounds = array<i64: 8, 4096>}, {pipeline_mode = #tpu.pipeline_mode<synchronous>, transform_indices = @transform_7, window_bounds = array<i64: 8, 64>}, {pipeline_mode = #tpu.pipeline_mode<synchronous>, transform_indices = @transform_8, window_bounds = array<i64: 8, 64>}]} {
    %c0 = arith.constant 0 : index
    %c0_0 = arith.constant 0 : index
    %0 = vector.load %arg1[%c0, %c0_0] : memref<8x128xf32, #tpu.memory_space<vmem>>, vector<8x128xf32>
    %1 = arith.truncf %0 : vector<8x128xf32> to vector<8x128xbf16>
    %c0_1 = arith.constant 0 : index
    %c0_2 = arith.constant 0 : index
    %2 = vector.load %arg2[%c0_1, %c0_2] : memref<128x4096xbf16, #tpu.memory_space<vmem>>, vector<128x4096xbf16>
    %cst = arith.constant dense<0.000000e+00> : vector<8x4096xf32>
    %3 = tpu.matmul %1, %2, %cst {dimension_numbers = #tpu.dot_dimension_numbers<[1], [0], [0], [1], [0, 0, 1, 1], [], []>} : vector<8x128xbf16>, vector<128x4096xbf16>, vector<8x4096xf32> -> vector<8x4096xf32>
    %c0_3 = arith.constant 0 : index
    %c0_4 = arith.constant 0 : index
    %4 = vector.load %arg3[%c0_3, %c0_4] : memref<1x4096xf32, #tpu.memory_space<vmem>>, vector<1x4096xf32>
    %5 = vector.broadcast %4 : vector<1x4096xf32> to vector<8x4096xf32>
    %6 = arith.addf %3, %5 : vector<8x4096xf32>
    %cst_5 = arith.constant 0.000000e+00 : f32
    %7 = vector.broadcast %cst_5 : f32 to vector<8x4096xf32>
    %8 = arith.maximumf %6, %7 : vector<8x4096xf32>
    %c0_6 = arith.constant 0 : index
    %c0_7 = arith.constant 0 : index
    %9 = vector.load %arg7[%c0_6, %c0_7] : memref<8x4096xf32, #tpu.memory_space<vmem>>, vector<8x4096xf32>
    tpu.vector_store %arg7[%c0_6, %c0_7], %8 {strides = array<i32>} : memref<8x4096xf32, #tpu.memory_space<vmem>>, vector<8x4096xf32>,
    %10 = arith.truncf %8 : vector<8x4096xf32> to vector<8x4096xbf16>
    %c0_8 = arith.constant 0 : index
    %c0_9 = arith.constant 0 : index
    %11 = vector.load %arg4[%c0_8, %c0_9] : memref<4096x64xbf16, #tpu.memory_space<vmem>>, vector<4096x64xbf16>
    %cst_10 = arith.constant dense<0.000000e+00> : vector<8x64xf32>
    %12 = tpu.matmul %10, %11, %cst_10 {dimension_numbers = #tpu.dot_dimension_numbers<[1], [0], [0], [1], [0, 0, 1, 1], [], []>} : vector<8x4096xbf16>, vector<4096x64xbf16>, vector<8x64xf32> -> vector<8x64xf32>
    %c0_11 = arith.constant 0 : index
    %c0_12 = arith.constant 0 : index
    %13 = vector.load %arg5[%c0_11, %c0_12] : memref<1x64xf32, #tpu.memory_space<vmem>>, vector<1x64xf32>
    %14 = vector.broadcast %13 : vector<1x64xf32> to vector<8x64xf32>
    %15 = arith.addf %12, %14 : vector<8x64xf32>
    %c0_13 = arith.constant 0 : index
    %c0_14 = arith.constant 0 : index
    %16 = vector.load %arg8[%c0_13, %c0_14] : memref<8x64xf32, #tpu.memory_space<vmem>>, vector<8x64xf32>
    tpu.vector_store %arg8[%c0_13, %c0_14], %15 {strides = array<i32>} : memref<8x64xf32, #tpu.memory_space<vmem>>, vector<8x64xf32>,
    %c0_15 = arith.constant 0 : index
    %17 = memref.load %arg6[%c0_15] : memref<1xf32, #tpu.memory_space<smem>>
    %18 = vector.broadcast %17 : f32 to vector<8x64xf32>
    %19 = arith.mulf %18, %15 : vector<8x64xf32>
    %20 = math.tanh %19 : vector<8x64xf32>
    %c0_16 = arith.constant 0 : index
    %c0_17 = arith.constant 0 : index
    %21 = vector.load %arg9[%c0_16, %c0_17] : memref<8x64xf32, #tpu.memory_space<vmem>>, vector<8x64xf32>
    tpu.vector_store %arg9[%c0_16, %c0_17], %20 {strides = array<i32>} : memref<8x64xf32, #tpu.memory_space<vmem>>, vector<8x64xf32>,
    return
  }
  func.func @transform_0(%arg0: i32) -> (i32, i32) {
    %c0_i32 = arith.constant 0 : i32
    %c0_i32_0 = arith.constant 0 : i32
    %c0_i32_1 = arith.constant 0 : i32
    return %c0_i32, %c0_i32_0 : i32, i32
  }
  func.func @transform_1(%arg0: i32) -> (i32, i32) {
    %c0_i32 = arith.constant 0 : i32
    %c0_i32_0 = arith.constant 0 : i32
    %c0_i32_1 = arith.constant 0 : i32
    return %c0_i32, %c0_i32_0 : i32, i32
  }
  func.func @transform_2(%arg0: i32) -> (i32, i32) {
    %c0_i32 = arith.constant 0 : i32
    %c0_i32_0 = arith.constant 0 : i32
    %c0_i32_1 = arith.constant 0 : i32
    return %c0_i32, %c0_i32_0 : i32, i32
  }
  func.func @transform_3(%arg0: i32) -> (i32, i32) {
    %c0_i32 = arith.constant 0 : i32
    %c0_i32_0 = arith.constant 0 : i32
    %c0_i32_1 = arith.constant 0 : i32
    return %c0_i32, %c0_i32_0 : i32, i32
  }
  func.func @transform_4(%arg0: i32) -> (i32, i32) {
    %c0_i32 = arith.constant 0 : i32
    %c0_i32_0 = arith.constant 0 : i32
    %c0_i32_1 = arith.constant 0 : i32
    return %c0_i32, %c0_i32_0 : i32, i32
  }
  func.func @transform_5(%arg0: i32) -> i32 {
    %c0_i32 = arith.constant 0 : i32
    %c0_i32_0 = arith.constant 0 : i32
    return %c0_i32 : i32
  }
  func.func @transform_6(%arg0: i32) -> (i32, i32) {
    %c0_i32 = arith.constant 0 : i32
    %c0_i32_0 = arith.constant 0 : i32
    %c0_i32_1 = arith.constant 0 : i32
    return %c0_i32, %c0_i32_0 : i32, i32
  }
  func.func @transform_7(%arg0: i32) -> (i32, i32) {
    %c0_i32 = arith.constant 0 : i32
    %c0_i32_0 = arith.constant 0 : i32
    %c0_i32_1 = arith.constant 0 : i32
    return %c0_i32, %c0_i32_0 : i32, i32
  }
  func.func @transform_8(%arg0: i32) -> (i32, i32) {
    %c0_i32 = arith.constant 0 : i32
    %c0_i32_0 = arith.constant 0 : i32
    %c0_i32_1 = arith.constant 0 : i32
    return %c0_i32, %c0_i32_0 : i32, i32
  }
}

</mosaic_0001>

<bundles_post_ra>
// kernel: tpu_custom_call.1
= control target key start
LH: loop header
LB: loop body
LE: loop exit
PB: predicated region body
PF: predicated region fallthrough
CT: control target
= control target key end

     0   :  { %15 = vsyncpa [#allocation4], 0  ;;  %v6428_v8 = vmov 0   ;;  %s8284_s0 = inlined_call_operand.vmem [shape: f32[8,128], index: 0, kind: input, shape index: {}]   ;;  %s8285_s1 = inlined_call_operand.vmem [shape: bf16[128,4096], index: 1, kind: input, shape index: {}]   ;;  %s8286_s2 = inlined_call_operand.vmem [shape: f32[1,4096], index: 2, kind: input, shape index: {}]   ;;  %s8287_s3 = inlined_call_operand.vmem [shape: bf16[4096,64], index: 3, kind: input, shape index: {}]   ;;  %s8288_s4 = inlined_call_operand.vmem [shape: f32[1,64], index: 4, kind: input, shape index: {}]   ;;  %s8289_s5 = inlined_call_operand.<no memory space> [shape: f32[1], index: 5, kind: input, shape index: {}]   ;;  %s8290_s6 = inlined_call_operand.hbm [shape: f32[8,4096], index: 6, kind: output, shape index: {0}]   ;;  %s8291_s7 = inlined_call_operand.hbm [shape: f32[8,64], index: 7, kind: output, shape index: {1}]   ;;  %s8292_s8 = inlined_call_operand.hbm [shape: f32[8,64], index: 8, kind: output, shape index: {2}]  }
   0x1   :  { %v32_v0 = vld [vmem:[%s8285_s1] sm:$0xff]  ;;  %v33_v2 = vld [vmem:[%s8285_s1 + $0x8] sm:$0xff]  ;;  %1768 = vmatprep.mubr.bf16.mxu0 %v6428_v8  ;;  %1809 = vmatprep.mubr.bf16.mxu1 %v6428_v8  ;;  %v34_v63 = vld [vmem:[%s8285_s1 + $0x10] sm:$0xff] }
   0x2   :  { %v48_v1 = vld [vmem:[%s8285_s1 + $0x80] sm:$0xff]  ;;  %v49_v4 = vld [vmem:[%s8285_s1 + $0x88] sm:$0xff] }
   0x3   :  { %v5232_v3 = vcombine.high %v32_v0, %v48_v1  ;;  %v5231_v5 = vcombine.low %v32_v0, %v48_v1  ;;  %v64_v6 = vld [vmem:[%s8285_s1 + $0x100] sm:$0xff]  ;;  %v5234_v9 = vcombine.high %v33_v2, %v49_v4  ;;  %v5233_v10 = vcombine.low %v33_v2, %v49_v4  ;;  %v65_v12 = vld [vmem:[%s8285_s1 + $0x108] sm:$0xff]  ;;  %v50_v0 = vld [vmem:[%s8285_s1 + $0x90] sm:$0xff] }
   0x4   :  { %v80_v7 = vld [vmem:[%s8285_s1 + $0x180] sm:$0xff]  ;;  %v81_v13 = vld [vmem:[%s8285_s1 + $0x188] sm:$0xff]  ;;  %v35_v1 = vld [vmem:[%s8285_s1 + $0x18] sm:$0xff] }
   0x5   :  { %v5264_v11 = vcombine.high %v64_v6, %v80_v7  ;;  %v96_v14 = vld [vmem:[%s8285_s1 + $0x200] sm:$0xff]  ;;  %1736 = vmatprep.subr.bf16.mxu0 %v5232_v3  ;;  %v5266_v15 = vcombine.high %v65_v12, %v81_v13  ;;  %v97_v17 = vld [vmem:[%s8285_s1 + $0x208] sm:$0xff]  ;;  %1777 = vmatprep.subr.bf16.mxu1 %v5234_v9  ;;  %v5263_v19 = vcombine.low %v64_v6, %v80_v7  ;;  %v51_v2 = vld [vmem:[%s8285_s1 + $0x98] sm:$0xff] }
   0x6   :  { %v112_v16 = vld [vmem:[%s8285_s1 + $0x280] sm:$0xff]  ;;  %v113_v18 = vld [vmem:[%s8285_s1 + $0x288] sm:$0xff]  ;;  %1737 = vmatpush1.bf16.msra.mxu0 %v5231_v5  ;;  %1778 = vmatpush1.bf16.msra.mxu1 %v5233_v10  ;;  %v5265_v20 = vcombine.low %v65_v12, %v81_v13  ;;  %v5236_v6 = vcombine.high %v34_v63, %v50_v0  ;;  %v5238_v7 = vcombine.high %v35_v1, %v51_v2  ;;  %v66_v9 = vld [vmem:[%s8285_s1 + $0x110] sm:$0xff] }
   0x7   :  { %1738 = vmatprep.subr.bf16.mxu0 %v5264_v11  ;;  %v5296_v21 = vcombine.high %v96_v14, %v112_v16  ;;  %1779 = vmatprep.subr.bf16.mxu1 %v5266_v15  ;;  %v5298_v22 = vcombine.high %v97_v17, %v113_v18  ;;  %v128_v23 = vld [vmem:[%s8285_s1 + $0x300] sm:$0xff]  ;;  %v129_v25 = vld [vmem:[%s8285_s1 + $0x308] sm:$0xff]  ;;  %v5295_v27 = vcombine.low %v96_v14, %v112_v16  ;;  %v82_v10 = vld [vmem:[%s8285_s1 + $0x190] sm:$0xff] }
   0x8   :  { %v144_v24 = vld [vmem:[%s8285_s1 + $0x380] sm:$0xff]  ;;  %v145_v26 = vld [vmem:[%s8285_s1 + $0x388] sm:$0xff]  ;;  %v5297_v28 = vcombine.low %v97_v17, %v113_v18  ;;  %v67_v12 = vld [vmem:[%s8285_s1 + $0x118] sm:$0xff]  ;;  %v5235_v14 = vcombine.low %v34_v63, %v50_v0  ;;  %v5237_v15 = vcombine.low %v35_v1, %v51_v2  ;;  %v5268_v16 = vcombine.high %v66_v9, %v82_v10 }
   0x9   :  { %v5328_v29 = vcombine.high %v128_v23, %v144_v24  ;;  %v5330_v30 = vcombine.high %v129_v25, %v145_v26  ;;  %v160_v31 = vld [vmem:[%s8285_s1 + $0x400] sm:$0xff]  ;;  %v161_v33 = vld [vmem:[%s8285_s1 + $0x408] sm:$0xff]  ;;  %v5327_v35 = vcombine.low %v128_v23, %v144_v24  ;;  %v5329_v36 = vcombine.low %v129_v25, %v145_v26  ;;  %v83_v13 = vld [vmem:[%s8285_s1 + $0x198] sm:$0xff] }
   0xa   :  { %1739 = vmatpush1.bf16.msra.mxu0 %v5263_v19  ;;  %1780 = vmatpush1.bf16.msra.mxu1 %v5265_v20  ;;  %v176_v32 = vld [vmem:[%s8285_s1 + $0x480] sm:$0xff]  ;;  %v177_v34 = vld [vmem:[%s8285_s1 + $0x488] sm:$0xff]  ;;  %v5270_v17 = vcombine.high %v67_v12, %v83_v13  ;;  %v98_v18 = vld [vmem:[%s8285_s1 + $0x210] sm:$0xff]  ;;  %v5269_v23 = vcombine.low %v67_v12, %v83_v13 }
   0xb   :  { %1740 = vmatprep.subr.bf16.mxu0 %v5296_v21  ;;  %1781 = vmatprep.subr.bf16.mxu1 %v5298_v22  ;;  %v5360_v37 = vcombine.high %v160_v31, %v176_v32  ;;  %v5362_v38 = vcombine.high %v161_v33, %v177_v34  ;;  %v192_v39 = vld [vmem:[%s8285_s1 + $0x500] sm:$0xff]  ;;  %v193_v41 = vld [vmem:[%s8285_s1 + $0x508] sm:$0xff]  ;;  %v5359_v43 = vcombine.low %v160_v31, %v176_v32  ;;  %v114_v19 = vld [vmem:[%s8285_s1 + $0x290] sm:$0xff] }
   0xc   :  { %v208_v40 = vld [vmem:[%s8285_s1 + $0x580] sm:$0xff]  ;;  %v209_v42 = vld [vmem:[%s8285_s1 + $0x588] sm:$0xff]  ;;  %v5361_v44 = vcombine.low %v161_v33, %v177_v34  ;;  %v99_v20 = vld [vmem:[%s8285_s1 + $0x218] sm:$0xff]  ;;  %v5267_v22 = vcombine.low %v66_v9, %v82_v10  ;;  %v5300_v24 = vcombine.high %v98_v18, %v114_v19 }
   0xd   :  { %v5392_v45 = vcombine.high %v192_v39, %v208_v40  ;;  %v5394_v46 = vcombine.high %v193_v41, %v209_v42  ;;  %v224_v47 = vld [vmem:[%s8285_s1 + $0x600] sm:$0xff]  ;;  %v225_v49 = vld [vmem:[%s8285_s1 + $0x608] sm:$0xff]  ;;  %v5391_v51 = vcombine.low %v192_v39, %v208_v40  ;;  %v5393_v52 = vcombine.low %v193_v41, %v209_v42  ;;  %v115_v21 = vld [vmem:[%s8285_s1 + $0x298] sm:$0xff] }
   0xe   :  { %1741 = vmatpush1.bf16.msra.mxu0 %v5295_v27  ;;  %1782 = vmatpush1.bf16.msra.mxu1 %v5297_v28  ;;  %v240_v48 = vld [vmem:[%s8285_s1 + $0x680] sm:$0xff]  ;;  %v241_v50 = vld [vmem:[%s8285_s1 + $0x688] sm:$0xff]  ;;  %v5302_v25 = vcombine.high %v99_v20, %v115_v21  ;;  %v130_v26 = vld [vmem:[%s8285_s1 + $0x310] sm:$0xff]  ;;  %v5301_v31 = vcombine.low %v99_v20, %v115_v21 }
   0xf   :  { %1742 = vmatprep.subr.bf16.mxu0 %v5328_v29  ;;  %1783 = vmatprep.subr.bf16.mxu1 %v5330_v30  ;;  %v5424_v53 = vcombine.high %v224_v47, %v240_v48  ;;  %v5426_v54 = vcombine.high %v225_v49, %v241_v50  ;;  %v256_v55 = vld [vmem:[%s8285_s1 + $0x700] sm:$0xff]  ;;  %v257_v57 = vld [vmem:[%s8285_s1 + $0x708] sm:$0xff]  ;;  %v5423_v59 = vcombine.low %v224_v47, %v240_v48  ;;  %v146_v27 = vld [vmem:[%s8285_s1 + $0x390] sm:$0xff] }
  0x10   :  { %v272_v56 = vld [vmem:[%s8285_s1 + $0x780] sm:$0xff]  ;;  %v273_v58 = vld [vmem:[%s8285_s1 + $0x788] sm:$0xff]  ;;  %v5425_v60 = vcombine.low %v225_v49, %v241_v50  ;;  %v131_v28 = vld [vmem:[%s8285_s1 + $0x318] sm:$0xff]  ;;  %v5299_v30 = vcombine.low %v98_v18, %v114_v19  ;;  %v5332_v32 = vcombine.high %v130_v26, %v146_v27 }
  0x11   :  { %v5456_v61 = vcombine.high %v256_v55, %v272_v56  ;;  %v5458_v62 = vcombine.high %v257_v57, %v273_v58  ;;  %v5455_v3 = vcombine.low %v256_v55, %v272_v56  ;;  %v30_v4 = vld [vmem:[%s8284_s0] sm:$0xff]  ;;  %v5457_v5 = vcombine.low %v257_v57, %v273_v58  ;;  %v147_v29 = vld [vmem:[%s8285_s1 + $0x398] sm:$0xff]  ;;  %v162_v34 = vld [vmem:[%s8285_s1 + $0x410] sm:$0xff] }
  0x12   :  { %1743 = vmatpush1.bf16.msra.mxu0 %v5327_v35  ;;  %1784 = vmatpush1.bf16.msra.mxu1 %v5329_v36  ;;  %v6596_v11 = vpack.c.bf16 %v30_v4, %v30_v4  ;;  %v5334_v33 = vcombine.high %v131_v28, %v147_v29  ;;  %v178_v35 = vld [vmem:[%s8285_s1 + $0x490] sm:$0xff]  ;;  %v163_v36 = vld [vmem:[%s8285_s1 + $0x418] sm:$0xff]  ;;  %v5333_v39 = vcombine.low %v131_v28, %v147_v29  ;;  %v36_v2 = vld [vmem:[%s8285_s1 + $0x20] sm:$0xff] }
  0x13   :  { %1744 = vmatprep.subr.bf16.mxu0 %v5360_v37  ;;  %1785 = vmatprep.subr.bf16.mxu1 %v5362_v38  ;;  %v179_v37 = vld [vmem:[%s8285_s1 + $0x498] sm:$0xff]  ;;  %v5331_v38 = vcombine.low %v130_v26, %v146_v27  ;;  %v5364_v40 = vcombine.high %v162_v34, %v178_v35  ;;  %v194_v42 = vld [vmem:[%s8285_s1 + $0x510] sm:$0xff]  ;;  %v37_v4 = vld [vmem:[%s8285_s1 + $0x28] sm:$0xff] }
  0x14   :  { %v5366_v41 = vcombine.high %v163_v36, %v179_v37  ;;  %v5365_v47 = vcombine.low %v163_v36, %v179_v37  ;;  %v226_v50 = vld [vmem:[%s8285_s1 + $0x610] sm:$0xff]  ;;  %v68_v12 = vld [vmem:[%s8285_s1 + $0x120] sm:$0xff]  ;;  %v101_v21 = vld [vmem:[%s8285_s1 + $0x228] sm:$0xff] }
  0x15   :  { %v258_v58 = vld [vmem:[%s8285_s1 + $0x710] sm:$0xff]  ;;  %v84_v13 = vld [vmem:[%s8285_s1 + $0x1a0] sm:$0xff]  ;;  %v133_v29 = vld [vmem:[%s8285_s1 + $0x328] sm:$0xff] }
  0x16   :  { %1745 = vmatpush1.bf16.msra.mxu0 %v5359_v43  ;;  %1786 = vmatpush1.bf16.msra.mxu1 %v5361_v44  ;;  %v210_v43 = vld [vmem:[%s8285_s1 + $0x590] sm:$0xff]  ;;  %v195_v44 = vld [vmem:[%s8285_s1 + $0x518] sm:$0xff]  ;;  %v5272_v18 = vcombine.high %v68_v12, %v84_v13  ;;  %v100_v19 = vld [vmem:[%s8285_s1 + $0x220] sm:$0xff] }
  0x17   :  { %1746 = vmatprep.subr.bf16.mxu0 %v5392_v45  ;;  %1787 = vmatprep.subr.bf16.mxu1 %v5394_v46  ;;  %v211_v45 = vld [vmem:[%s8285_s1 + $0x598] sm:$0xff]  ;;  %v5363_v46 = vcombine.low %v162_v34, %v178_v35  ;;  %v5396_v48 = vcombine.high %v194_v42, %v210_v43  ;;  %v116_v20 = vld [vmem:[%s8285_s1 + $0x2a0] sm:$0xff]  ;;  %v165_v37 = vld [vmem:[%s8285_s1 + $0x428] sm:$0xff] }
  0x18   :  { %v5398_v49 = vcombine.high %v195_v44, %v211_v45  ;;  %v5397_v55 = vcombine.low %v195_v44, %v211_v45  ;;  %v5304_v26 = vcombine.high %v100_v19, %v116_v20  ;;  %v132_v27 = vld [vmem:[%s8285_s1 + $0x320] sm:$0xff]  ;;  %v197_v45 = vld [vmem:[%s8285_s1 + $0x528] sm:$0xff] }
  0x19   :  { %v148_v28 = vld [vmem:[%s8285_s1 + $0x3a0] sm:$0xff] }
  0x1a   :  { %1747 = vmatpush1.bf16.msra.mxu0 %v5391_v51  ;;  %1788 = vmatpush1.bf16.msra.mxu1 %v5393_v52  ;;  %v242_v51 = vld [vmem:[%s8285_s1 + $0x690] sm:$0xff]  ;;  %v227_v52 = vld [vmem:[%s8285_s1 + $0x618] sm:$0xff]  ;;  %v5336_v34 = vcombine.high %v132_v27, %v148_v28  ;;  %v164_v35 = vld [vmem:[%s8285_s1 + $0x420] sm:$0xff] }
  0x1b   :  { %1748 = vmatprep.subr.bf16.mxu0 %v5424_v53  ;;  %1789 = vmatprep.subr.bf16.mxu1 %v5426_v54  ;;  %v243_v53 = vld [vmem:[%s8285_s1 + $0x698] sm:$0xff]  ;;  %v5395_v54 = vcombine.low %v194_v42, %v210_v43  ;;  %v5428_v56 = vcombine.high %v226_v50, %v242_v51  ;;  %v180_v36 = vld [vmem:[%s8285_s1 + $0x4a0] sm:$0xff] }
  0x1c   :  { %v5430_v57 = vcombine.high %v227_v52, %v243_v53  ;;  %v5429_v63 = vcombine.low %v227_v52, %v243_v53  ;;  %v5368_v42 = vcombine.high %v164_v35, %v180_v36  ;;  %v196_v43 = vld [vmem:[%s8285_s1 + $0x520] sm:$0xff]  ;;  %v229_v53 = vld [vmem:[%s8285_s1 + $0x628] sm:$0xff] }
  0x1d   :  { %v212_v44 = vld [vmem:[%s8285_s1 + $0x5a0] sm:$0xff] }
  0x1e   :  { %1749 = vmatpush1.bf16.msra.mxu0 %v5423_v59  ;;  %1790 = vmatpush1.bf16.msra.mxu1 %v5425_v60  ;;  %v274_v59 = vld [vmem:[%s8285_s1 + $0x790] sm:$0xff]  ;;  %v259_v60 = vld [vmem:[%s8285_s1 + $0x718] sm:$0xff]  ;;  %v244_v52 = vld [vmem:[%s8285_s1 + $0x6a0] sm:$0xff] }
  0x1f   :  { %1750 = vmatprep.subr.bf16.mxu0 %v5456_v61  ;;  %1791 = vmatprep.subr.bf16.mxu1 %v5458_v62  ;;  %v275_v61 = vld [vmem:[%s8285_s1 + $0x798] sm:$0xff]  ;;  %v5427_v62 = vcombine.low %v226_v50, %v242_v51  ;;  %v5460_v0 = vcombine.high %v258_v58, %v274_v59  ;;  %v5400_v50 = vcombine.high %v196_v43, %v212_v44  ;;  %v228_v51 = vld [vmem:[%s8285_s1 + $0x620] sm:$0xff] }
  0x20   :  { %v5462_v1 = vcombine.high %v259_v60, %v275_v61 }
  0x22   :  { %1751 = vmatpush1.bf16.msra.mxu0 %v5455_v3  ;;  %1792 = vmatpush1.bf16.msra.mxu1 %v5457_v5  ;;  %v52_v3 = vld [vmem:[%s8285_s1 + $0xa0] sm:$0xff]  ;;  %v53_v5 = vld [vmem:[%s8285_s1 + $0xa8] sm:$0xff] }
  0x23   :  { %1818 = vmatprep.subr.bf16.mxu0 %v5236_v6  ;;  %1859 = vmatprep.subr.bf16.mxu1 %v5238_v7  ;;  %v5459_v6 = vcombine.low %v258_v58, %v274_v59  ;;  %v5461_v7 = vcombine.low %v259_v60, %v275_v61  ;;  %v5240_v9 = vcombine.high %v36_v2, %v52_v3  ;;  %v260_v59 = vld [vmem:[%s8285_s1 + $0x720] sm:$0xff]  ;;  %v261_v61 = vld [vmem:[%s8285_s1 + $0x728] sm:$0xff] }
  0x24   :  { %v5242_v10 = vcombine.high %v37_v4, %v53_v5  ;;  %v5432_v58 = vcombine.high %v228_v51, %v244_v52  ;;  %v276_v60 = vld [vmem:[%s8285_s1 + $0x7a0] sm:$0xff] }
  0x25   :  { %1769 = vmatmul.mubr.bf16.vlgmr.msra.gmra.mrb[0].mxu0 %v6596_v11  ;;  %1810 = vmatmul.mubr.bf16.vlgmr.msra.gmra.mrb[0].mxu1 %v6596_v11 }
  0x26   :  { %1819 = vmatpush1.bf16.msra.mxu0 %v5235_v14  ;;  %1860 = vmatpush1.bf16.msra.mxu1 %v5237_v15  ;;  %v69_v14 = vld [vmem:[%s8285_s1 + $0x128] sm:$0xff] }
  0x27   :  { %1820 = vmatprep.subr.bf16.mxu0 %v5268_v16  ;;  %1861 = vmatprep.subr.bf16.mxu1 %v5270_v17  ;;  %v85_v15 = vld [vmem:[%s8285_s1 + $0x1a8] sm:$0xff]  ;;  %v5239_v16 = vcombine.low %v36_v2, %v52_v3  ;;  %v5241_v17 = vcombine.low %v37_v4, %v53_v5  ;;  %v5464_v2 = vcombine.high %v260_v59, %v276_v60  ;;  %v38_v3 = vld [vmem:[%s8285_s1 + $0x30] sm:$0xff]  ;;  %v39_v5 = vld [vmem:[%s8285_s1 + $0x38] sm:$0xff] }
  0x28   :  { %1850 = vmatprep.mubr.bf16.mxu0 %v6428_v8  ;;  %1891 = vmatprep.mubr.bf16.mxu1 %v6428_v8  ;;  %v54_v4 = vld [vmem:[%s8285_s1 + $0xb0] sm:$0xff] }
  0x2a   :  { %1821 = vmatpush1.bf16.msra.mxu0 %v5267_v22  ;;  %1862 = vmatpush1.bf16.msra.mxu1 %v5269_v23  ;;  %v5274_v22 = vcombine.high %v69_v14, %v85_v15  ;;  %v117_v23 = vld [vmem:[%s8285_s1 + $0x2a8] sm:$0xff] }
  0x2b   :  { %1822 = vmatprep.subr.bf16.mxu0 %v5300_v24  ;;  %1863 = vmatprep.subr.bf16.mxu1 %v5302_v25  ;;  %v5271_v24 = vcombine.low %v68_v12, %v84_v13  ;;  %v5273_v25 = vcombine.low %v69_v14, %v85_v15  ;;  %v5244_v12 = vcombine.high %v38_v3, %v54_v4  ;;  %v70_v13 = vld [vmem:[%s8285_s1 + $0x130] sm:$0xff]  ;;  %v71_v15 = vld [vmem:[%s8285_s1 + $0x138] sm:$0xff] }
  0x2c   :  { %v86_v14 = vld [vmem:[%s8285_s1 + $0x1b0] sm:$0xff] }
  0x2e   :  { %1823 = vmatpush1.bf16.msra.mxu0 %v5299_v30  ;;  %1864 = vmatpush1.bf16.msra.mxu1 %v5301_v31  ;;  %v5306_v30 = vcombine.high %v101_v21, %v117_v23  ;;  %v149_v31 = vld [vmem:[%s8285_s1 + $0x3a8] sm:$0xff] }
  0x2f   :  { %1824 = vmatprep.subr.bf16.mxu0 %v5332_v32  ;;  %1865 = vmatprep.subr.bf16.mxu1 %v5334_v33  ;;  %v5303_v32 = vcombine.low %v100_v19, %v116_v20  ;;  %v5305_v33 = vcombine.low %v101_v21, %v117_v23  ;;  %v5276_v20 = vcombine.high %v70_v13, %v86_v14  ;;  %v102_v21 = vld [vmem:[%s8285_s1 + $0x230] sm:$0xff]  ;;  %v103_v23 = vld [vmem:[%s8285_s1 + $0x238] sm:$0xff] }
  0x32   :  { %1825 = vmatpush1.bf16.msra.mxu0 %v5331_v38  ;;  %1866 = vmatpush1.bf16.msra.mxu1 %v5333_v39  ;;  %v5338_v38 = vcombine.high %v133_v29, %v149_v31  ;;  %v181_v39 = vld [vmem:[%s8285_s1 + $0x4a8] sm:$0xff] }
  0x33   :  { %1826 = vmatprep.subr.bf16.mxu0 %v5364_v40  ;;  %1867 = vmatprep.subr.bf16.mxu1 %v5366_v41  ;;  %v5335_v40 = vcombine.low %v132_v27, %v148_v28  ;;  %v5337_v41 = vcombine.low %v133_v29, %v149_v31  ;;  %v134_v29 = vld [vmem:[%s8285_s1 + $0x330] sm:$0xff]  ;;  %v135_v31 = vld [vmem:[%s8285_s1 + $0x338] sm:$0xff] }
  0x36   :  { %1827 = vmatpush1.bf16.msra.mxu0 %v5363_v46  ;;  %1868 = vmatpush1.bf16.msra.mxu1 %v5365_v47  ;;  %v5370_v46 = vcombine.high %v165_v37, %v181_v39  ;;  %v213_v47 = vld [vmem:[%s8285_s1 + $0x5a8] sm:$0xff] }
  0x37   :  { %1828 = vmatprep.subr.bf16.mxu0 %v5396_v48  ;;  %1869 = vmatprep.subr.bf16.mxu1 %v5398_v49  ;;  %v5367_v48 = vcombine.low %v164_v35, %v180_v36  ;;  %v5369_v49 = vcombine.low %v165_v37, %v181_v39  ;;  %v166_v37 = vld [vmem:[%s8285_s1 + $0x430] sm:$0xff]  ;;  %v167_v39 = vld [vmem:[%s8285_s1 + $0x438] sm:$0xff] }
  0x3a   :  { %1829 = vmatpush1.bf16.msra.mxu0 %v5395_v54  ;;  %1870 = vmatpush1.bf16.msra.mxu1 %v5397_v55  ;;  %v5402_v54 = vcombine.high %v197_v45, %v213_v47  ;;  %v245_v55 = vld [vmem:[%s8285_s1 + $0x6a8] sm:$0xff] }
  0x3b   :  { %1830 = vmatprep.subr.bf16.mxu0 %v5428_v56  ;;  %1871 = vmatprep.subr.bf16.mxu1 %v5430_v57  ;;  %v5399_v56 = vcombine.low %v196_v43, %v212_v44  ;;  %v5401_v57 = vcombine.low %v197_v45, %v213_v47  ;;  %v198_v45 = vld [vmem:[%s8285_s1 + $0x530] sm:$0xff]  ;;  %v199_v47 = vld [vmem:[%s8285_s1 + $0x538] sm:$0xff] }
  0x3e   :  { %1831 = vmatpush1.bf16.msra.mxu0 %v5427_v62  ;;  %1872 = vmatpush1.bf16.msra.mxu1 %v5429_v63  ;;  %v5434_v62 = vcombine.high %v229_v53, %v245_v55  ;;  %v277_v63 = vld [vmem:[%s8285_s1 + $0x7a8] sm:$0xff] }
  0x3f   :  { %1832 = vmatprep.subr.bf16.mxu0 %v5460_v0  ;;  %1873 = vmatprep.subr.bf16.mxu1 %v5462_v1  ;;  %v5431_v0 = vcombine.low %v228_v51, %v244_v52  ;;  %v5433_v1 = vcombine.low %v229_v53, %v245_v55  ;;  %v230_v53 = vld [vmem:[%s8285_s1 + $0x630] sm:$0xff] }
  0x42   :  { %1833 = vmatpush1.bf16.msra.mxu0 %v5459_v6  ;;  %1874 = vmatpush1.bf16.msra.mxu1 %v5461_v7  ;;  %v5466_v6 = vcombine.high %v261_v61, %v277_v63  ;;  %v55_v7 = vld [vmem:[%s8285_s1 + $0xb8] sm:$0xff] }
  0x43   :  { %1900 = vmatprep.subr.bf16.mxu0 %v5240_v9  ;;  %1941 = vmatprep.subr.bf16.mxu1 %v5242_v10  ;;  %v5463_v9 = vcombine.low %v260_v59, %v276_v60  ;;  %v5465_v10 = vcombine.low %v261_v61, %v277_v63  ;;  %v5245_v19 = vcombine.low %v39_v5, %v55_v7  ;;  %v262_v61 = vld [vmem:[%s8285_s1 + $0x730] sm:$0xff] }
  0x44   :  { %v278_v63 = vld [vmem:[%s8285_s1 + $0x7b0] sm:$0xff] }
  0x45   :  { %1851 = vmatmul.mubr.bf16.vlgmr.msra.gmra.mrb[4].mxu0 %v6596_v11  ;;  %1892 = vmatmul.mubr.bf16.vlgmr.msra.gmra.mrb[4].mxu1 %v6596_v11 }
  0x46   :  { %1901 = vmatpush1.bf16.msra.mxu0 %v5239_v16  ;;  %1942 = vmatpush1.bf16.msra.mxu1 %v5241_v17  ;;  %v5246_v16 = vcombine.high %v39_v5, %v55_v7  ;;  %v87_v17 = vld [vmem:[%s8285_s1 + $0x1b8] sm:$0xff]  ;;  %v40_v5 = vld [vmem:[%s8285_s1 + $0x40] sm:$0xff]  ;;  %v41_v7 = vld [vmem:[%s8285_s1 + $0x48] sm:$0xff] }
  0x47   :  { %1902 = vmatprep.subr.bf16.mxu0 %v5272_v18  ;;  %1943 = vmatprep.subr.bf16.mxu1 %v5274_v22  ;;  %v5243_v18 = vcombine.low %v38_v3, %v54_v4  ;;  %v118_v22 = vld [vmem:[%s8285_s1 + $0x2b0] sm:$0xff]  ;;  %v5277_v27 = vcombine.low %v71_v15, %v87_v17  ;;  %v5468_v4 = vcombine.high %v262_v61, %v278_v63 }
  0x48   :  { %1932 = vmatprep.mubr.bf16.mxu0 %v6428_v8  ;;  %1973 = vmatprep.mubr.bf16.mxu1 %v6428_v8  ;;  %v5308_v28 = vcombine.high %v102_v21, %v118_v22 }
  0x4a   :  { %1903 = vmatpush1.bf16.msra.mxu0 %v5271_v24  ;;  %1944 = vmatpush1.bf16.msra.mxu1 %v5273_v25  ;;  %v5278_v24 = vcombine.high %v71_v15, %v87_v17  ;;  %v119_v25 = vld [vmem:[%s8285_s1 + $0x2b8] sm:$0xff]  ;;  %v72_v15 = vld [vmem:[%s8285_s1 + $0x140] sm:$0xff]  ;;  %v73_v17 = vld [vmem:[%s8285_s1 + $0x148] sm:$0xff] }
  0x4b   :  { %1904 = vmatprep.subr.bf16.mxu0 %v5304_v26  ;;  %1945 = vmatprep.subr.bf16.mxu1 %v5306_v30  ;;  %v5275_v26 = vcombine.low %v70_v13, %v86_v14  ;;  %v150_v30 = vld [vmem:[%s8285_s1 + $0x3b0] sm:$0xff]  ;;  %v5309_v35 = vcombine.low %v103_v23, %v119_v25 }
  0x4c   :  { %v5340_v36 = vcombine.high %v134_v29, %v150_v30 }
  0x4e   :  { %1905 = vmatpush1.bf16.msra.mxu0 %v5303_v32  ;;  %1946 = vmatpush1.bf16.msra.mxu1 %v5305_v33  ;;  %v5310_v32 = vcombine.high %v103_v23, %v119_v25  ;;  %v151_v33 = vld [vmem:[%s8285_s1 + $0x3b8] sm:$0xff]  ;;  %v120_v25 = vld [vmem:[%s8285_s1 + $0x2c0] sm:$0xff] }
  0x4f   :  { %1906 = vmatprep.subr.bf16.mxu0 %v5336_v34  ;;  %1947 = vmatprep.subr.bf16.mxu1 %v5338_v38  ;;  %v5307_v34 = vcombine.low %v102_v21, %v118_v22  ;;  %v182_v38 = vld [vmem:[%s8285_s1 + $0x4b0] sm:$0xff]  ;;  %v5341_v43 = vcombine.low %v135_v31, %v151_v33 }
  0x50   :  { %v5372_v44 = vcombine.high %v166_v37, %v182_v38 }
  0x52   :  { %1907 = vmatpush1.bf16.msra.mxu0 %v5335_v40  ;;  %1948 = vmatpush1.bf16.msra.mxu1 %v5337_v41  ;;  %v5342_v40 = vcombine.high %v135_v31, %v151_v33  ;;  %v183_v41 = vld [vmem:[%s8285_s1 + $0x4b8] sm:$0xff]  ;;  %v152_v33 = vld [vmem:[%s8285_s1 + $0x3c0] sm:$0xff] }
  0x53   :  { %1908 = vmatprep.subr.bf16.mxu0 %v5368_v42  ;;  %1949 = vmatprep.subr.bf16.mxu1 %v5370_v46  ;;  %v5339_v42 = vcombine.low %v134_v29, %v150_v30  ;;  %v214_v46 = vld [vmem:[%s8285_s1 + $0x5b0] sm:$0xff]  ;;  %v5373_v51 = vcombine.low %v167_v39, %v183_v41  ;;  %v136_v29 = vld [vmem:[%s8285_s1 + $0x340] sm:$0xff] }
  0x54   :  { %v5404_v52 = vcombine.high %v198_v45, %v214_v46 }
  0x56   :  { %1909 = vmatpush1.bf16.msra.mxu0 %v5367_v48  ;;  %1950 = vmatpush1.bf16.msra.mxu1 %v5369_v49  ;;  %v5374_v48 = vcombine.high %v167_v39, %v183_v41  ;;  %v215_v49 = vld [vmem:[%s8285_s1 + $0x5b8] sm:$0xff]  ;;  %v5344_v39 = vcombine.high %v136_v29, %v152_v33  ;;  %v169_v41 = vld [vmem:[%s8285_s1 + $0x448] sm:$0xff] }
  0x57   :  { %1910 = vmatprep.subr.bf16.mxu0 %v5400_v50  ;;  %1951 = vmatprep.subr.bf16.mxu1 %v5402_v54  ;;  %v5371_v50 = vcombine.low %v166_v37, %v182_v38  ;;  %v246_v54 = vld [vmem:[%s8285_s1 + $0x6b0] sm:$0xff]  ;;  %v5406_v55 = vcombine.high %v199_v47, %v215_v49  ;;  %v5405_v59 = vcombine.low %v199_v47, %v215_v49  ;;  %v168_v37 = vld [vmem:[%s8285_s1 + $0x440] sm:$0xff]  ;;  %v201_v49 = vld [vmem:[%s8285_s1 + $0x548] sm:$0xff] }
  0x58   :  { %v5436_v60 = vcombine.high %v230_v53, %v246_v54 }
  0x5a   :  { %1911 = vmatpush1.bf16.msra.mxu0 %v5399_v56  ;;  %1952 = vmatpush1.bf16.msra.mxu1 %v5401_v57  ;;  %v231_v56 = vld [vmem:[%s8285_s1 + $0x638] sm:$0xff] }
  0x5b   :  { %1912 = vmatprep.subr.bf16.mxu0 %v5432_v58  ;;  %1953 = vmatprep.subr.bf16.mxu1 %v5434_v62  ;;  %v247_v57 = vld [vmem:[%s8285_s1 + $0x6b8] sm:$0xff]  ;;  %v5403_v58 = vcombine.low %v198_v45, %v214_v46  ;;  %v200_v45 = vld [vmem:[%s8285_s1 + $0x540] sm:$0xff] }
  0x5c   :  { %v5438_v62 = vcombine.high %v231_v56, %v247_v57  ;;  %v5437_v3 = vcombine.low %v231_v56, %v247_v57  ;;  %v248_v56 = vld [vmem:[%s8285_s1 + $0x6c0] sm:$0xff]  ;;  %v233_v57 = vld [vmem:[%s8285_s1 + $0x648] sm:$0xff] }
  0x5e   :  { %1913 = vmatpush1.bf16.msra.mxu0 %v5431_v0  ;;  %1954 = vmatpush1.bf16.msra.mxu1 %v5433_v1  ;;  %v263_v0 = vld [vmem:[%s8285_s1 + $0x738] sm:$0xff] }
  0x5f   :  { %1914 = vmatprep.subr.bf16.mxu0 %v5464_v2  ;;  %1955 = vmatprep.subr.bf16.mxu1 %v5466_v6  ;;  %v279_v1 = vld [vmem:[%s8285_s1 + $0x7b8] sm:$0xff]  ;;  %v5435_v2 = vcombine.low %v230_v53, %v246_v54  ;;  %v56_v6 = vld [vmem:[%s8285_s1 + $0xc0] sm:$0xff] }
  0x60   :  { %v5469_v13 = vcombine.low %v263_v0, %v279_v1  ;;  %v5248_v14 = vcombine.high %v40_v5, %v56_v6  ;;  %v232_v53 = vld [vmem:[%s8285_s1 + $0x640] sm:$0xff] }
  0x62   :  { %1915 = vmatpush1.bf16.msra.mxu0 %v5463_v9  ;;  %1956 = vmatpush1.bf16.msra.mxu1 %v5465_v10  ;;  %v5470_v9 = vcombine.high %v263_v0, %v279_v1  ;;  %v57_v10 = vld [vmem:[%s8285_s1 + $0xc8] sm:$0xff]  ;;  %v280_v1 = vld [vmem:[%s8285_s1 + $0x7c0] sm:$0xff] }
  0x63   :  { %1982 = vmatprep.subr.bf16.mxu0 %v5244_v12  ;;  %2023 = vmatprep.subr.bf16.mxu1 %v5246_v16  ;;  %v5467_v12 = vcombine.low %v262_v61, %v278_v63  ;;  %v88_v16 = vld [vmem:[%s8285_s1 + $0x1c0] sm:$0xff]  ;;  %v5249_v21 = vcombine.low %v41_v7, %v57_v10 }
  0x64   :  { %v5280_v22 = vcombine.high %v72_v15, %v88_v16  ;;  %v264_v63 = vld [vmem:[%s8285_s1 + $0x740] sm:$0xff] }
  0x65   :  { %1933 = vmatmul.mubr.bf16.vlgmr.msra.gmra.mrb[8].mxu0 %v6596_v11  ;;  %1974 = vmatmul.mubr.bf16.vlgmr.msra.gmra.mrb[8].mxu1 %v6596_v11 }
  0x66   :  { %1983 = vmatpush1.bf16.msra.mxu0 %v5243_v18  ;;  %2024 = vmatpush1.bf16.msra.mxu1 %v5245_v19  ;;  %v5250_v18 = vcombine.high %v41_v7, %v57_v10  ;;  %v89_v19 = vld [vmem:[%s8285_s1 + $0x1c8] sm:$0xff] }
  0x67   :  { %1984 = vmatprep.subr.bf16.mxu0 %v5276_v20  ;;  %2025 = vmatprep.subr.bf16.mxu1 %v5278_v24  ;;  %v5247_v20 = vcombine.low %v40_v5, %v56_v6  ;;  %v5282_v23 = vcombine.high %v73_v17, %v89_v19  ;;  %v104_v24 = vld [vmem:[%s8285_s1 + $0x240] sm:$0xff]  ;;  %v5281_v30 = vcombine.low %v73_v17, %v89_v19  ;;  %v42_v5 = vld [vmem:[%s8285_s1 + $0x50] sm:$0xff]  ;;  %v75_v19 = vld [vmem:[%s8285_s1 + $0x158] sm:$0xff] }
  0x68   :  { %2014 = vmatprep.mubr.bf16.mxu0 %v6428_v8  ;;  %2055 = vmatprep.mubr.bf16.mxu1 %v6428_v8  ;;  %v5312_v31 = vcombine.high %v104_v24, %v120_v25  ;;  %v58_v6 = vld [vmem:[%s8285_s1 + $0xd0] sm:$0xff] }
  0x69   :  { %v5252_v17 = vcombine.high %v42_v5, %v58_v6 }
  0x6a   :  { %1985 = vmatpush1.bf16.msra.mxu0 %v5275_v26  ;;  %2026 = vmatpush1.bf16.msra.mxu1 %v5277_v27  ;;  %v105_v26 = vld [vmem:[%s8285_s1 + $0x248] sm:$0xff] }
  0x6b   :  { %1986 = vmatprep.subr.bf16.mxu0 %v5308_v28  ;;  %2027 = vmatprep.subr.bf16.mxu1 %v5310_v32  ;;  %v121_v27 = vld [vmem:[%s8285_s1 + $0x2c8] sm:$0xff]  ;;  %v5279_v28 = vcombine.low %v72_v15, %v88_v16  ;;  %v74_v15 = vld [vmem:[%s8285_s1 + $0x150] sm:$0xff] }
  0x6c   :  { %v5314_v32 = vcombine.high %v105_v26, %v121_v27  ;;  %v5313_v38 = vcombine.low %v105_v26, %v121_v27 }
  0x6e   :  { %1987 = vmatpush1.bf16.msra.mxu0 %v5307_v34  ;;  %2028 = vmatpush1.bf16.msra.mxu1 %v5309_v35  ;;  %v137_v34 = vld [vmem:[%s8285_s1 + $0x348] sm:$0xff] }
  0x6f   :  { %1988 = vmatprep.subr.bf16.mxu0 %v5340_v36  ;;  %2029 = vmatprep.subr.bf16.mxu1 %v5342_v40  ;;  %v153_v35 = vld [vmem:[%s8285_s1 + $0x3c8] sm:$0xff]  ;;  %v5311_v36 = vcombine.low %v104_v24, %v120_v25  ;;  %v184_v40 = vld [vmem:[%s8285_s1 + $0x4c0] sm:$0xff]  ;;  %v122_v24 = vld [vmem:[%s8285_s1 + $0x2d0] sm:$0xff] }
  0x70   :  { %v5345_v46 = vcombine.low %v137_v34, %v153_v35  ;;  %v5376_v47 = vcombine.high %v168_v37, %v184_v40 }
  0x72   :  { %1989 = vmatpush1.bf16.msra.mxu0 %v5339_v42  ;;  %2030 = vmatpush1.bf16.msra.mxu1 %v5341_v43  ;;  %v5346_v42 = vcombine.high %v137_v34, %v153_v35  ;;  %v185_v43 = vld [vmem:[%s8285_s1 + $0x4c8] sm:$0xff]  ;;  %v154_v35 = vld [vmem:[%s8285_s1 + $0x3d0] sm:$0xff] }
  0x73   :  { %1990 = vmatprep.subr.bf16.mxu0 %v5372_v44  ;;  %2031 = vmatprep.subr.bf16.mxu1 %v5374_v48  ;;  %v5343_v44 = vcombine.low %v136_v29, %v152_v33  ;;  %v216_v48 = vld [vmem:[%s8285_s1 + $0x5c0] sm:$0xff]  ;;  %v5377_v54 = vcombine.low %v169_v41, %v185_v43  ;;  %v123_v29 = vld [vmem:[%s8285_s1 + $0x2d8] sm:$0xff] }
  0x76   :  { %1991 = vmatpush1.bf16.msra.mxu0 %v5371_v50  ;;  %2032 = vmatpush1.bf16.msra.mxu1 %v5373_v51  ;;  %v5378_v50 = vcombine.high %v169_v41, %v185_v43  ;;  %v217_v51 = vld [vmem:[%s8285_s1 + $0x5c8] sm:$0xff]  ;;  %v171_v43 = vld [vmem:[%s8285_s1 + $0x458] sm:$0xff] }
  0x77   :  { %1992 = vmatprep.subr.bf16.mxu0 %v5404_v52  ;;  %2033 = vmatprep.subr.bf16.mxu1 %v5406_v55  ;;  %v5375_v52 = vcombine.low %v168_v37, %v184_v40  ;;  %v5408_v55 = vcombine.high %v200_v45, %v216_v48  ;;  %v5409_v61 = vcombine.low %v201_v49, %v217_v51  ;;  %v155_v37 = vld [vmem:[%s8285_s1 + $0x3d8] sm:$0xff] }
  0x7a   :  { %1993 = vmatpush1.bf16.msra.mxu0 %v5403_v58  ;;  %2034 = vmatpush1.bf16.msra.mxu1 %v5405_v59  ;;  %v5410_v58 = vcombine.high %v201_v49, %v217_v51  ;;  %v249_v59 = vld [vmem:[%s8285_s1 + $0x6c8] sm:$0xff]  ;;  %v203_v51 = vld [vmem:[%s8285_s1 + $0x558] sm:$0xff] }
  0x7b   :  { %1994 = vmatprep.subr.bf16.mxu0 %v5436_v60  ;;  %2035 = vmatprep.subr.bf16.mxu1 %v5438_v62  ;;  %v5407_v60 = vcombine.low %v200_v45, %v216_v48  ;;  %v5440_v62 = vcombine.high %v232_v53, %v248_v56  ;;  %v5442_v0 = vcombine.high %v233_v57, %v249_v59  ;;  %v187_v45 = vld [vmem:[%s8285_s1 + $0x4d8] sm:$0xff] }
  0x7c   :  { %v5441_v7 = vcombine.low %v233_v57, %v249_v59  ;;  %v235_v59 = vld [vmem:[%s8285_s1 + $0x658] sm:$0xff] }
  0x7e   :  { %1995 = vmatpush1.bf16.msra.mxu0 %v5435_v2  ;;  %2036 = vmatpush1.bf16.msra.mxu1 %v5437_v3  ;;  %v265_v2 = vld [vmem:[%s8285_s1 + $0x748] sm:$0xff] }
  0x7f   :  { %1996 = vmatprep.subr.bf16.mxu0 %v5468_v4  ;;  %2037 = vmatprep.subr.bf16.mxu1 %v5470_v9  ;;  %v281_v3 = vld [vmem:[%s8285_s1 + $0x7c8] sm:$0xff]  ;;  %v5439_v4 = vcombine.low %v232_v53, %v248_v56  ;;  %v5472_v9 = vcombine.high %v264_v63, %v280_v1  ;;  %v219_v53 = vld [vmem:[%s8285_s1 + $0x5d8] sm:$0xff]  ;;  %v5381_v56 = vcombine.low %v171_v43, %v187_v45 }
  0x80   :  { %v5474_v10 = vcombine.high %v265_v2, %v281_v3  ;;  %v5473_v16 = vcombine.low %v265_v2, %v281_v3  ;;  %v282_v2 = vld [vmem:[%s8285_s1 + $0x7d0] sm:$0xff] }
  0x82   :  { %1997 = vmatpush1.bf16.msra.mxu0 %v5467_v12  ;;  %2038 = vmatpush1.bf16.msra.mxu1 %v5469_v13  ;;  %v43_v12 = vld [vmem:[%s8285_s1 + $0x58] sm:$0xff] }
  0x83   :  { %2064 = vmatprep.subr.bf16.mxu0 %v5248_v14  ;;  %2105 = vmatprep.subr.bf16.mxu1 %v5250_v18  ;;  %v59_v13 = vld [vmem:[%s8285_s1 + $0xd8] sm:$0xff]  ;;  %v5471_v14 = vcombine.low %v264_v63, %v280_v1  ;;  %v90_v18 = vld [vmem:[%s8285_s1 + $0x1d0] sm:$0xff] }
  0x84   :  { %v5253_v25 = vcombine.low %v43_v12, %v59_v13  ;;  %v5284_v26 = vcombine.high %v74_v15, %v90_v18  ;;  %v266_v63 = vld [vmem:[%s8285_s1 + $0x750] sm:$0xff] }
  0x85   :  { %2015 = vmatmul.mubr.bf16.vlgmr.msra.gmra.mrb[12].mxu0 %v6596_v11  ;;  %2056 = vmatmul.mubr.bf16.vlgmr.msra.gmra.mrb[12].mxu1 %v6596_v11 }
  0x86   :  { %2065 = vmatpush1.bf16.msra.mxu0 %v5247_v20  ;;  %2106 = vmatpush1.bf16.msra.mxu1 %v5249_v21  ;;  %v5254_v20 = vcombine.high %v43_v12, %v59_v13  ;;  %v91_v21 = vld [vmem:[%s8285_s1 + $0x1d8] sm:$0xff]  ;;  %v5476_v12 = vcombine.high %v266_v63, %v282_v2 }
  0x87   :  { %2066 = vmatprep.subr.bf16.mxu0 %v5280_v22  ;;  %2107 = vmatprep.subr.bf16.mxu1 %v5282_v23  ;;  %v5251_v22 = vcombine.low %v42_v5, %v58_v6  ;;  %v106_v23 = vld [vmem:[%s8285_s1 + $0x250] sm:$0xff]  ;;  %v5286_v27 = vcombine.high %v75_v19, %v91_v21  ;;  %v283_v5 = vld [vmem:[%s8285_s1 + $0x7d8] sm:$0xff] }
  0x88   :  { %2096 = vmatprep.mubr.bf16.mxu0 %v6428_v8  ;;  %2137 = vmatprep.mubr.bf16.mxu1 %v6428_v8  ;;  %v5316_v33 = vcombine.high %v106_v23, %v122_v24 }
  0x8a   :  { %2067 = vmatpush1.bf16.msra.mxu0 %v5279_v28  ;;  %2108 = vmatpush1.bf16.msra.mxu1 %v5281_v30  ;;  %v107_v28 = vld [vmem:[%s8285_s1 + $0x258] sm:$0xff]  ;;  %v5283_v30 = vcombine.low %v74_v15, %v90_v18  ;;  %v61_v15 = vld [vmem:[%s8285_s1 + $0xe8] sm:$0xff] }
  0x8b   :  { %2068 = vmatprep.subr.bf16.mxu0 %v5312_v31  ;;  %2109 = vmatprep.subr.bf16.mxu1 %v5314_v32  ;;  %v138_v31 = vld [vmem:[%s8285_s1 + $0x350] sm:$0xff]  ;;  %v5285_v32 = vcombine.low %v75_v19, %v91_v21  ;;  %v5318_v34 = vcombine.high %v107_v28, %v123_v29  ;;  %v5317_v40 = vcombine.low %v107_v28, %v123_v29  ;;  %v77_v21 = vld [vmem:[%s8285_s1 + $0x168] sm:$0xff] }
  0x8c   :  { %v5348_v41 = vcombine.high %v138_v31, %v154_v35 }
  0x8e   :  { %2069 = vmatpush1.bf16.msra.mxu0 %v5311_v36  ;;  %2110 = vmatpush1.bf16.msra.mxu1 %v5313_v38  ;;  %v139_v36 = vld [vmem:[%s8285_s1 + $0x358] sm:$0xff]  ;;  %v5315_v38 = vcombine.low %v106_v23, %v122_v24  ;;  %v93_v23 = vld [vmem:[%s8285_s1 + $0x1e8] sm:$0xff] }
  0x8f   :  { %2070 = vmatprep.subr.bf16.mxu0 %v5344_v39  ;;  %2111 = vmatprep.subr.bf16.mxu1 %v5346_v42  ;;  %v170_v39 = vld [vmem:[%s8285_s1 + $0x450] sm:$0xff]  ;;  %v5349_v48 = vcombine.low %v139_v36, %v155_v37  ;;  %v5290_v29 = vcombine.high %v77_v21, %v93_v23 }
  0x90   :  { %v186_v42 = vld [vmem:[%s8285_s1 + $0x4d0] sm:$0xff] }
  0x91   :  { %v5380_v49 = vcombine.high %v170_v39, %v186_v42 }
  0x92   :  { %2071 = vmatpush1.bf16.msra.mxu0 %v5343_v44  ;;  %2112 = vmatpush1.bf16.msra.mxu1 %v5345_v46  ;;  %v5350_v44 = vcombine.high %v139_v36, %v155_v37  ;;  %v5347_v46 = vcombine.low %v138_v31, %v154_v35  ;;  %v125_v31 = vld [vmem:[%s8285_s1 + $0x2e8] sm:$0xff]  ;;  %v156_v37 = vld [vmem:[%s8285_s1 + $0x3e0] sm:$0xff] }
  0x93   :  { %2072 = vmatprep.subr.bf16.mxu0 %v5376_v47  ;;  %2113 = vmatprep.subr.bf16.mxu1 %v5378_v50  ;;  %v202_v47 = vld [vmem:[%s8285_s1 + $0x550] sm:$0xff] }
  0x94   :  { %v218_v50 = vld [vmem:[%s8285_s1 + $0x5d0] sm:$0xff] }
  0x95   :  { %v5412_v57 = vcombine.high %v202_v47, %v218_v50 }
  0x96   :  { %2073 = vmatpush1.bf16.msra.mxu0 %v5375_v52  ;;  %2114 = vmatpush1.bf16.msra.mxu1 %v5377_v54  ;;  %v5382_v52 = vcombine.high %v171_v43, %v187_v45  ;;  %v5379_v54 = vcombine.low %v170_v39, %v186_v42  ;;  %v157_v39 = vld [vmem:[%s8285_s1 + $0x3e8] sm:$0xff] }
  0x97   :  { %2074 = vmatprep.subr.bf16.mxu0 %v5408_v55  ;;  %2115 = vmatprep.subr.bf16.mxu1 %v5410_v58  ;;  %v234_v55 = vld [vmem:[%s8285_s1 + $0x650] sm:$0xff]  ;;  %v173_v45 = vld [vmem:[%s8285_s1 + $0x468] sm:$0xff] }
  0x98   :  { %v250_v58 = vld [vmem:[%s8285_s1 + $0x6d0] sm:$0xff] }
  0x99   :  { %v5444_v1 = vcombine.high %v234_v55, %v250_v58  ;;  %v5443_v6 = vcombine.low %v234_v55, %v250_v58  ;;  %v221_v55 = vld [vmem:[%s8285_s1 + $0x5e8] sm:$0xff] }
  0x9a   :  { %2075 = vmatpush1.bf16.msra.mxu0 %v5407_v60  ;;  %2116 = vmatpush1.bf16.msra.mxu1 %v5409_v61  ;;  %v5414_v60 = vcombine.high %v203_v51, %v219_v53  ;;  %v251_v61 = vld [vmem:[%s8285_s1 + $0x6d8] sm:$0xff] }
  0x9b   :  { %2076 = vmatprep.subr.bf16.mxu0 %v5440_v62  ;;  %2117 = vmatprep.subr.bf16.mxu1 %v5442_v0  ;;  %v5411_v62 = vcombine.low %v202_v47, %v218_v50  ;;  %v5413_v0 = vcombine.low %v203_v51, %v219_v53  ;;  %v5446_v3 = vcombine.high %v235_v59, %v251_v61  ;;  %v189_v47 = vld [vmem:[%s8285_s1 + $0x4e8] sm:$0xff] }
  0x9c   :  { %v205_v53 = vld [vmem:[%s8285_s1 + $0x568] sm:$0xff]  ;;  %v5385_v58 = vcombine.low %v173_v45, %v189_v47 }
  0x9e   :  { %2077 = vmatpush1.bf16.msra.mxu0 %v5439_v4  ;;  %2118 = vmatpush1.bf16.msra.mxu1 %v5441_v7  ;;  %v267_v4 = vld [vmem:[%s8285_s1 + $0x758] sm:$0xff]  ;;  %v44_v7 = vld [vmem:[%s8285_s1 + $0x60] sm:$0xff] }
  0x9f   :  { %2078 = vmatprep.subr.bf16.mxu0 %v5472_v9  ;;  %2119 = vmatprep.subr.bf16.mxu1 %v5474_v10  ;;  %v60_v9 = vld [vmem:[%s8285_s1 + $0xe0] sm:$0xff]  ;;  %v5445_v10 = vcombine.low %v235_v59, %v251_v61  ;;  %v5478_v13 = vcombine.high %v267_v4, %v283_v5  ;;  %v5477_v18 = vcombine.low %v267_v4, %v283_v5  ;;  %v237_v61 = vld [vmem:[%s8285_s1 + $0x668] sm:$0xff] }
  0xa0   :  { %v5256_v19 = vcombine.high %v44_v7, %v60_v9  ;;  %v5255_v24 = vcombine.low %v44_v7, %v60_v9  ;;  %v285_v7 = vld [vmem:[%s8285_s1 + $0x7e8] sm:$0xff] }
  0xa2   :  { %2079 = vmatpush1.bf16.msra.mxu0 %v5471_v14  ;;  %2120 = vmatpush1.bf16.msra.mxu1 %v5473_v16  ;;  %v45_v14 = vld [vmem:[%s8285_s1 + $0x68] sm:$0xff]  ;;  %v5475_v16 = vcombine.low %v266_v63, %v282_v2  ;;  %v284_v2 = vld [vmem:[%s8285_s1 + $0x7e0] sm:$0xff] }
  0xa3   :  { %2146 = vmatprep.subr.bf16.mxu0 %v5252_v17  ;;  %2187 = vmatprep.subr.bf16.mxu1 %v5254_v20  ;;  %v76_v17 = vld [vmem:[%s8285_s1 + $0x160] sm:$0xff]  ;;  %v253_v63 = vld [vmem:[%s8285_s1 + $0x6e8] sm:$0xff] }
  0xa4   :  { %v92_v20 = vld [vmem:[%s8285_s1 + $0x1e0] sm:$0xff]  ;;  %v5450_v5 = vcombine.high %v237_v61, %v253_v63 }
  0xa5   :  { %2097 = vmatmul.mubr.bf16.vlgmr.msra.gmra.mrb[16].mxu0 %v6596_v11  ;;  %2138 = vmatmul.mubr.bf16.vlgmr.msra.gmra.mrb[16].mxu1 %v6596_v11  ;;  %v5288_v28 = vcombine.high %v76_v17, %v92_v20 }
  0xa6   :  { %2147 = vmatpush1.bf16.msra.mxu0 %v5251_v22  ;;  %2188 = vmatpush1.bf16.msra.mxu1 %v5253_v25  ;;  %v5258_v22 = vcombine.high %v45_v14, %v61_v15  ;;  %v108_v25 = vld [vmem:[%s8285_s1 + $0x260] sm:$0xff] }
  0xa7   :  { %2148 = vmatprep.subr.bf16.mxu0 %v5284_v26  ;;  %2189 = vmatprep.subr.bf16.mxu1 %v5286_v27  ;;  %v124_v26 = vld [vmem:[%s8285_s1 + $0x2e0] sm:$0xff]  ;;  %v5257_v27 = vcombine.low %v45_v14, %v61_v15 }
  0xa8   :  { %2178 = vmatprep.mubr.bf16.mxu0 %v6428_v8  ;;  %2219 = vmatprep.mubr.bf16.mxu1 %v6428_v8  ;;  %v5320_v35 = vcombine.high %v108_v25, %v124_v26 }
  0xaa   :  { %2149 = vmatpush1.bf16.msra.mxu0 %v5283_v30  ;;  %2190 = vmatpush1.bf16.msra.mxu1 %v5285_v32  ;;  %v109_v30 = vld [vmem:[%s8285_s1 + $0x268] sm:$0xff]  ;;  %v5287_v32 = vcombine.low %v76_v17, %v92_v20  ;;  %v63_v17 = vld [vmem:[%s8285_s1 + $0xf8] sm:$0xff] }
  0xab   :  { %2150 = vmatprep.subr.bf16.mxu0 %v5316_v33  ;;  %2191 = vmatprep.subr.bf16.mxu1 %v5318_v34  ;;  %v140_v33 = vld [vmem:[%s8285_s1 + $0x360] sm:$0xff]  ;;  %v5289_v34 = vcombine.low %v77_v21, %v93_v23  ;;  %v5322_v36 = vcombine.high %v109_v30, %v125_v31  ;;  %v5321_v42 = vcombine.low %v109_v30, %v125_v31  ;;  %v79_v23 = vld [vmem:[%s8285_s1 + $0x178] sm:$0xff] }
  0xac   :  { %v5352_v43 = vcombine.high %v140_v33, %v156_v37 }
  0xae   :  { %2151 = vmatpush1.bf16.msra.mxu0 %v5315_v38  ;;  %2192 = vmatpush1.bf16.msra.mxu1 %v5317_v40  ;;  %v141_v38 = vld [vmem:[%s8285_s1 + $0x368] sm:$0xff]  ;;  %v5319_v40 = vcombine.low %v108_v25, %v124_v26  ;;  %v95_v25 = vld [vmem:[%s8285_s1 + $0x1f8] sm:$0xff] }
  0xaf   :  { %2152 = vmatprep.subr.bf16.mxu0 %v5348_v41  ;;  %2193 = vmatprep.subr.bf16.mxu1 %v5350_v44  ;;  %v172_v41 = vld [vmem:[%s8285_s1 + $0x460] sm:$0xff]  ;;  %v5353_v50 = vcombine.low %v141_v38, %v157_v39  ;;  %v5294_v31 = vcombine.high %v79_v23, %v95_v25 }
  0xb0   :  { %v188_v44 = vld [vmem:[%s8285_s1 + $0x4e0] sm:$0xff] }
  0xb1   :  { %v5384_v51 = vcombine.high %v172_v41, %v188_v44 }
  0xb2   :  { %2153 = vmatpush1.bf16.msra.mxu0 %v5347_v46  ;;  %2194 = vmatpush1.bf16.msra.mxu1 %v5349_v48  ;;  %v5354_v46 = vcombine.high %v141_v38, %v157_v39  ;;  %v5351_v48 = vcombine.low %v140_v33, %v156_v37  ;;  %v127_v33 = vld [vmem:[%s8285_s1 + $0x2f8] sm:$0xff]  ;;  %v296_v38 = vlaneseq }
  0xb3   :  { %2154 = vmatprep.subr.bf16.mxu0 %v5380_v49  ;;  %2195 = vmatprep.subr.bf16.mxu1 %v5382_v52  ;;  %v204_v49 = vld [vmem:[%s8285_s1 + $0x560] sm:$0xff] }
  0xb4   :  { %v220_v52 = vld [vmem:[%s8285_s1 + $0x5e0] sm:$0xff] }
  0xb5   :  { %v5416_v59 = vcombine.high %v204_v49, %v220_v52 }
  0xb6   :  { %2155 = vmatpush1.bf16.msra.mxu0 %v5379_v54  ;;  %2196 = vmatpush1.bf16.msra.mxu1 %v5381_v56  ;;  %v5386_v54 = vcombine.high %v173_v45, %v189_v47  ;;  %v5383_v56 = vcombine.low %v172_v41, %v188_v44  ;;  %v143_v41 = vld [vmem:[%s8285_s1 + $0x378] sm:$0xff]  ;;  %v174_v44 = vld [vmem:[%s8285_s1 + $0x470] sm:$0xff] }
  0xb7   :  { %2156 = vmatprep.subr.bf16.mxu0 %v5412_v57  ;;  %2197 = vmatprep.subr.bf16.mxu1 %v5414_v60  ;;  %v236_v57 = vld [vmem:[%s8285_s1 + $0x660] sm:$0xff]  ;;  %v190_v47 = vld [vmem:[%s8285_s1 + $0x4f0] sm:$0xff] }
  0xb8   :  { %v252_v60 = vld [vmem:[%s8285_s1 + $0x6e0] sm:$0xff] }
  0xb9   :  { %v5448_v4 = vcombine.high %v236_v57, %v252_v60  ;;  %v5447_v9 = vcombine.low %v236_v57, %v252_v60  ;;  %v207_v57 = vld [vmem:[%s8285_s1 + $0x578] sm:$0xff] }
  0xba   :  { %2157 = vmatpush1.bf16.msra.mxu0 %v5411_v62  ;;  %2198 = vmatpush1.bf16.msra.mxu1 %v5413_v0  ;;  %v5418_v62 = vcombine.high %v205_v53, %v221_v55  ;;  %v5415_v0 = vcombine.low %v204_v49, %v220_v52  ;;  %v7241_v49 = vshrl.u32 %v296_v38, 7  ;;  %v206_v52 = vld [vmem:[%s8285_s1 + $0x570] sm:$0xff] }
  0xbb   :  { %2158 = vmatprep.subr.bf16.mxu0 %v5444_v1  ;;  %2199 = vmatprep.subr.bf16.mxu1 %v5446_v3  ;;  %v268_v1 = vld [vmem:[%s8285_s1 + $0x760] sm:$0xff]  ;;  %v5417_v3 = vcombine.low %v205_v53, %v221_v55 }
  0xbc   :  { %v5480_v14 = vcombine.high %v268_v1, %v284_v2  ;;  %v7250_v55 = vsub.s32 0, %v7241_v49  ;;  %v7264_v60 = vsub.s32 1, %v7241_v49 }
  0xbe   :  { %2159 = vmatpush1.bf16.msra.mxu0 %v5443_v6  ;;  %2200 = vmatpush1.bf16.msra.mxu1 %v5445_v10  ;;  %v269_v6 = vld [vmem:[%s8285_s1 + $0x768] sm:$0xff]  ;;  %v46_v10 = vld [vmem:[%s8285_s1 + $0x70] sm:$0xff] }
  0xbf   :  { %2160 = vmatprep.subr.bf16.mxu0 %v5476_v12  ;;  %2201 = vmatprep.subr.bf16.mxu1 %v5478_v13  ;;  %v62_v12 = vld [vmem:[%s8285_s1 + $0xf0] sm:$0xff]  ;;  %v5449_v13 = vcombine.low %v237_v61, %v253_v63  ;;  %v5482_v15 = vcombine.high %v269_v6, %v285_v7  ;;  %v5481_v20 = vcombine.low %v269_v6, %v285_v7  ;;  %v223_v61 = vld [vmem:[%s8285_s1 + $0x5f8] sm:$0xff]  ;;  %v7270_v63 = vsub.s32 2, %v7241_v49 }
  0xc0   :  { %v5260_v21 = vcombine.high %v46_v10, %v62_v12  ;;  %v5259_v26 = vcombine.low %v46_v10, %v62_v12  ;;  %v5422_v6 = vcombine.high %v207_v57, %v223_v61  ;;  %v255_v7 = vld [vmem:[%s8285_s1 + $0x6f8] sm:$0xff] }
  0xc2   :  { %2161 = vmatpush1.bf16.msra.mxu0 %v5475_v16  ;;  %2202 = vmatpush1.bf16.msra.mxu1 %v5477_v18  ;;  %v47_v16 = vld [vmem:[%s8285_s1 + $0x78] sm:$0xff]  ;;  %v5479_v18 = vcombine.low %v268_v1, %v284_v2  ;;  %v7276_v2 = vsub.s32 3, %v7241_v49 }
  0xc3   :  { %2228 = vmatprep.subr.bf16.mxu0 %v5256_v19  ;;  %2269 = vmatprep.subr.bf16.mxu1 %v5258_v22  ;;  %v78_v19 = vld [vmem:[%s8285_s1 + $0x170] sm:$0xff] }
  0xc4   :  { %v94_v22 = vld [vmem:[%s8285_s1 + $0x1f0] sm:$0xff] }
  0xc5   :  { %2179 = vmatmul.mubr.bf16.vlgmr.msra.gmra.mrb[20].mxu0 %v6596_v11  ;;  %2220 = vmatmul.mubr.bf16.vlgmr.msra.gmra.mrb[20].mxu1 %v6596_v11  ;;  %v5292_v30 = vcombine.high %v78_v19, %v94_v22 }
  0xc6   :  { %2229 = vmatpush1.bf16.msra.mxu0 %v5255_v24  ;;  %2270 = vmatpush1.bf16.msra.mxu1 %v5257_v27  ;;  %v5262_v24 = vcombine.high %v47_v16, %v63_v17  ;;  %v110_v27 = vld [vmem:[%s8285_s1 + $0x270] sm:$0xff] }
  0xc7   :  { %2230 = vmatprep.subr.bf16.mxu0 %v5288_v28  ;;  %2271 = vmatprep.subr.bf16.mxu1 %v5290_v29  ;;  %v126_v28 = vld [vmem:[%s8285_s1 + $0x2f0] sm:$0xff]  ;;  %v5261_v29 = vcombine.low %v47_v16, %v63_v17 }
  0xc8   :  { %2260 = vmatprep.mubr.bf16.mxu0 %v6428_v8  ;;  %2301 = vmatprep.mubr.bf16.mxu1 %v6428_v8  ;;  %v5324_v37 = vcombine.high %v110_v27, %v126_v28  ;;  %v270_v17 = vld [vmem:[%s8285_s1 + $0x770] sm:$0xff] }
  0xca   :  { %2231 = vmatpush1.bf16.msra.mxu0 %v5287_v32  ;;  %2272 = vmatpush1.bf16.msra.mxu1 %v5289_v34  ;;  %v111_v32 = vld [vmem:[%s8285_s1 + $0x278] sm:$0xff]  ;;  %v5291_v34 = vcombine.low %v78_v19, %v94_v22 }
  0xcb   :  { %2232 = vmatprep.subr.bf16.mxu0 %v5320_v35  ;;  %2273 = vmatprep.subr.bf16.mxu1 %v5322_v36  ;;  %v142_v35 = vld [vmem:[%s8285_s1 + $0x370] sm:$0xff]  ;;  %v5293_v36 = vcombine.low %v79_v23, %v95_v25  ;;  %v5326_v39 = vcombine.high %v111_v32, %v127_v33  ;;  %v5325_v45 = vcombine.low %v111_v32, %v127_v33  ;;  %v287_v25 = vld [vmem:[%s8285_s1 + $0x7f8] sm:$0xff] }
  0xce   :  { %2233 = vmatpush1.bf16.msra.mxu0 %v5319_v40  ;;  %2274 = vmatpush1.bf16.msra.mxu1 %v5321_v42  ;;  %v158_v40 = vld [vmem:[%s8285_s1 + $0x3f0] sm:$0xff]  ;;  %v159_v42 = vld [vmem:[%s8285_s1 + $0x3f8] sm:$0xff] }
  0xcf   :  { %2234 = vmatprep.subr.bf16.mxu0 %v5352_v43  ;;  %2275 = vmatprep.subr.bf16.mxu1 %v5354_v46  ;;  %v5323_v43 = vcombine.low %v110_v27, %v126_v28  ;;  %v5356_v46 = vcombine.high %v142_v35, %v158_v40  ;;  %v5357_v53 = vcombine.low %v143_v41, %v159_v42 }
  0xd2   :  { %2235 = vmatpush1.bf16.msra.mxu0 %v5351_v48  ;;  %2276 = vmatpush1.bf16.msra.mxu1 %v5353_v50  ;;  %v175_v48 = vld [vmem:[%s8285_s1 + $0x478] sm:$0xff] }
  0xd3   :  { %2236 = vmatprep.subr.bf16.mxu0 %v5384_v51  ;;  %2277 = vmatprep.subr.bf16.mxu1 %v5386_v54  ;;  %v191_v50 = vld [vmem:[%s8285_s1 + $0x4f8] sm:$0xff]  ;;  %v5355_v51 = vcombine.low %v142_v35, %v158_v40  ;;  %v5388_v54 = vcombine.high %v174_v44, %v190_v47 }
  0xd4   :  { %v5389_v1 = vcombine.low %v175_v48, %v191_v50 }
  0xd6   :  { %2237 = vmatpush1.bf16.msra.mxu0 %v5383_v56  ;;  %2278 = vmatpush1.bf16.msra.mxu1 %v5385_v58  ;;  %v222_v56 = vld [vmem:[%s8285_s1 + $0x5f0] sm:$0xff]  ;;  %v5390_v58 = vcombine.high %v175_v48, %v191_v50  ;;  %v6104_v48 = vld [vmem:[%s8287_s3 + $0x48] sm:$0xff]  }
  0xd7   :  { %2238 = vmatprep.subr.bf16.mxu0 %v5416_v59  ;;  %2279 = vmatprep.subr.bf16.mxu1 %v5418_v62  ;;  %v7261_v59 = vld [vmem:[%s8286_s2] sm:$0xff]  ;;  %v5387_v62 = vcombine.low %v174_v44, %v190_v47  ;;  %v6105_v50 = vld [vmem:[%s8287_s3 + $0xc8] sm:$0xff]  }
  0xd8   :  { %v307_v10 = vrot.slane %v7261_v59, %v7270_v63  ;;  %v303_v12 = vrot.slane %v7261_v59, %v7264_v60  ;;  %v6100_v44 = vld [vmem:[%s8287_s3 + $0x40] sm:$0xff]  }
  0xd9   :  { %v6103_v47 = vld [vmem:[%s8287_s3 + $0x80] sm:$0xff]  }
  0xda   :  { %2239 = vmatpush1.bf16.msra.mxu0 %v5415_v0  ;;  %2280 = vmatpush1.bf16.msra.mxu1 %v5417_v3  ;;  %v238_v0 = vld [vmem:[%s8285_s1 + $0x670] sm:$0xff]  ;;  %v5420_v3 = vcombine.high %v206_v52, %v222_v56 }
  0xdb   :  { %2240 = vmatprep.subr.bf16.mxu0 %v5448_v4  ;;  %2281 = vmatprep.subr.bf16.mxu1 %v5450_v5  ;;  %v254_v4 = vld [vmem:[%s8285_s1 + $0x6f0] sm:$0xff]  ;;  %v239_v5 = vld [vmem:[%s8285_s1 + $0x678] sm:$0xff] }
  0xdc   :  { %v5452_v16 = vcombine.high %v238_v0, %v254_v4  ;;  %v5454_v19 = vcombine.high %v239_v5, %v255_v7  ;;  %v5453_v35 = vcombine.low %v239_v5, %v255_v7  ;;  %v7373_v5 = vsub.s32 4, %v7241_v49 }
  0xdd   :  { %v7379_v7 = vsub.s32 6, %v7241_v49 }
  0xde   :  { %2241 = vmatpush1.bf16.msra.mxu0 %v5447_v9  ;;  %2282 = vmatpush1.bf16.msra.mxu1 %v5449_v13  ;;  %v299_v9 = vrot.slane %v7261_v59, %v7250_v55  ;;  %v5419_v13 = vcombine.low %v206_v52, %v222_v56  ;;  %v6109_v56 = vld [vmem:[%s8287_s3 + $0xd0] sm:$0xff]  }
  0xdf   :  { %2242 = vmatprep.subr.bf16.mxu0 %v5480_v14  ;;  %2283 = vmatprep.subr.bf16.mxu1 %v5482_v15  ;;  %v311_v14 = vrot.slane %v7261_v59, %v7276_v2  ;;  %v5421_v15 = vcombine.low %v207_v57, %v223_v61  ;;  %v6111_v57 = vld [vmem:[%s8287_s3 + $0x90] sm:$0xff]   ;;  %v6113_v61 = vld [vmem:[%s8287_s3 + $0xd8] sm:$0xff]  }
  0xe2   :  { %2243 = vmatpush1.bf16.msra.mxu0 %v5479_v18  ;;  %2284 = vmatpush1.bf16.msra.mxu1 %v5481_v20  ;;  %v286_v20 = vld [vmem:[%s8285_s1 + $0x7f0] sm:$0xff] }
  0xe3   :  { %2310 = vmatprep.subr.bf16.mxu0 %v5260_v21  ;;  %2351 = vmatprep.subr.bf16.mxu1 %v5262_v24  ;;  %v271_v24 = vld [vmem:[%s8285_s1 + $0x778] sm:$0xff] }
  0xe4   :  { %v5486_v40 = vcombine.high %v271_v24, %v287_v25 }
  0xe5   :  { %2261 = vmatmul.mubr.bf16.vlgmr.msra.gmra.mrb[24].mxu0 %v6596_v11  ;;  %2302 = vmatmul.mubr.bf16.vlgmr.msra.gmra.mrb[24].mxu1 %v6596_v11 }
  0xe6   :  { %2311 = vmatpush1.bf16.msra.mxu0 %v5259_v26  ;;  %2352 = vmatpush1.bf16.msra.mxu1 %v5261_v29 }
  0xe7   :  { %2312 = vmatprep.subr.bf16.mxu0 %v5292_v30  ;;  %2353 = vmatprep.subr.bf16.mxu1 %v5294_v31  ;;  %v5451_v30 = vcombine.low %v238_v0, %v254_v4  ;;  %v6115_v0 = vld [vmem:[%s8287_s3 + $0x98] sm:$0xff]   ;;  %v6118_v4 = vld [vmem:[%s8287_s3 + $0x20] sm:$0xff]  }
  0xe8   :  { %2342 = vmatprep.mubr.bf16.mxu0 %v6428_v8  ;;  %2383 = vmatprep.mubr.bf16.mxu1 %v6428_v8  ;;  %v5358_v8 = vcombine.high %v143_v41, %v159_v42  ;;  %v5483_v42 = vcombine.low %v270_v17, %v286_v20 }
  0xea   :  { %2313 = vmatpush1.bf16.msra.mxu0 %v5291_v34  ;;  %2354 = vmatpush1.bf16.msra.mxu1 %v5293_v36  ;;  %v5484_v36 = vcombine.high %v270_v17, %v286_v20 }
  0xeb   :  { %2314 = vmatprep.subr.bf16.mxu0 %v5324_v37  ;;  %2355 = vmatprep.subr.bf16.mxu1 %v5326_v39 }
  0xee   :  { %2315 = vmatpush1.bf16.msra.mxu0 %v5323_v43  ;;  %2356 = vmatpush1.bf16.msra.mxu1 %v5325_v45  ;;  %v5485_v43 = vcombine.low %v271_v24, %v287_v25  ;;  %v6101_v45 = vld [vmem:[%s8287_s3 + $0xc0] sm:$0xff]  }
  0xef   :  { %2316 = vmatprep.subr.bf16.mxu0 %v5356_v46  ;;  %2357 = vmatprep.subr.bf16.mxu1 %v5358_v8  ;;  %v6102_v46 = vld [vmem:[%s8287_s3] sm:$0xff]  }
  0xf2   :  { %2317 = vmatpush1.bf16.msra.mxu0 %v5355_v51  ;;  %2358 = vmatpush1.bf16.msra.mxu1 %v5357_v53  ;;  %v6106_v51 = vld [vmem:[%s8287_s3 + $0x8] sm:$0xff]  }
  0xf3   :  { %2318 = vmatprep.subr.bf16.mxu0 %v5388_v54  ;;  %2359 = vmatprep.subr.bf16.mxu1 %v5390_v58  ;;  %v6107_v53 = vld [vmem:[%s8287_s3 + $0x88] sm:$0xff]   ;;  %v6108_v54 = vld [vmem:[%s8287_s3 + $0x50] sm:$0xff]   ;;  %v6112_v58 = vld [vmem:[%s8287_s3 + $0x58] sm:$0xff]  }
  0xf6   :  { %2319 = vmatpush1.bf16.msra.mxu0 %v5387_v62  ;;  %2360 = vmatpush1.bf16.msra.mxu1 %v5389_v1  ;;  %v6114_v62 = vld [vmem:[%s8287_s3 + $0x18] sm:$0xff]   ;;  %v6116_v1 = vld [vmem:[%s8287_s3 + $0x60] sm:$0xff]  }
  0xf7   :  { %2320 = vmatprep.subr.bf16.mxu0 %v5420_v3  ;;  %2361 = vmatprep.subr.bf16.mxu1 %v5422_v6  ;;  %v6117_v3 = vld [vmem:[%s8287_s3 + $0xe0] sm:$0xff]  }
  0xf8   :  { %v1770_v18 = vpop.f32.mrb[0].mxu0  ;;  %v1811_v22 = vpop.f32.mrb[0].mxu1  ;;  %v6119_v6 = vld [vmem:[%s8287_s3 + $0xa0] sm:$0xff]  }
  0xf9   :  { %v1771_v21 = vadd.f32 %v1770_v18, %v299_v9  ;;  %v1772_v23 = vpop.f32.mrb[1].mxu0  ;;  %v1812_v26 = vadd.f32 %v1811_v22, %v307_v10  ;;  %v1813_v28 = vpop.f32.mrb[1].mxu1  ;;  %v7382_v9 = vsub.s32 5, %v7241_v49  ;;  %v7385_v10 = vsub.s32 7, %v7241_v49  ;;  %v6123_v49 = vld [vmem:[%s8287_s3 + $0xa8] sm:$0xff]   ;;  %v6124_v18 = vld [vmem:[%s8287_s3 + $0x70] sm:$0xff]  }
  0xfa   :  { %v1773_v27 = vadd.f32 %v1772_v23, %v303_v12  ;;  %v1774_v29 = vpop.f32.mrb[2].mxu0  ;;  %2321 = vmatpush1.bf16.msra.mxu0 %v5419_v13  ;;  %v1814_v32 = vadd.f32 %v1813_v28, %v311_v14  ;;  %v1815_v33 = vpop.f32.mrb[2].mxu1  ;;  %2362 = vmatpush1.bf16.msra.mxu1 %v5421_v15  ;;  %v6120_v12 = vld [vmem:[%s8287_s3 + $0x68] sm:$0xff]   ;;  %v315_v15 = vrot.slane %v7261_v59, %v7373_v5 }
  0xfb   :  { %v7307_v31 = vmax.f32 %v1771_v21, 0.0  ;;  %v1775_v34 = vpop.f32.mrb[3].mxu0  ;;  %2322 = vmatprep.subr.bf16.mxu0 %v5452_v16  ;;  %v7309_v37 = vmax.f32 %v1812_v26, 0.0  ;;  %v1816_v39 = vpop.f32.mrb[3].mxu1  ;;  %2363 = vmatprep.subr.bf16.mxu1 %v5454_v19  ;;  %v6121_v13 = vld [vmem:[%s8287_s3 + $0xe8] sm:$0xff]   ;;  %v323_v16 = vrot.slane %v7261_v59, %v7379_v7  ;;  %v319_v17 = vrot.slane %v7261_v59, %v7382_v9  ;;  %v6125_v21 = vld [vmem:[%s8287_s3 + $0xf0] sm:$0xff]  }
  0xfc   :  { %v2393_v38 = vmax.f32 %v1773_v27, 0.0  ;;  %v2395_v41 = vmax.f32 %v1814_v32, 0.0  ;;  %v6122_v14 = vld [vmem:[%s8287_s3 + $0x28] sm:$0xff]   ;;  %v327_v19 = vrot.slane %v7261_v59, %v7385_v10  ;;  %v6126_v29 = vld [vmem:[%s8287_s3 + $0x30] sm:$0xff]  }
  0xfd   :  { %2424 = vst [vmem:[#allocation3] sm:$0xff] %v7307_v31  ;;  %2426 = vst [vmem:[#allocation3 + $0x10] sm:$0xff] %v7309_v37  ;;  %v6127_v59 = vld [vmem:[%s8287_s3 + $0xb0] sm:$0xff]  }
  0xfe   :  { %2425 = vst [vmem:[#allocation3 + $0x8] sm:$0xff] %v2393_v38  ;;  %2323 = vmatpush1.bf16.msra.mxu0 %v5451_v30  ;;  %2427 = vst [vmem:[#allocation3 + $0x18] sm:$0xff] %v2395_v41  ;;  %2364 = vmatpush1.bf16.msra.mxu1 %v5453_v35  ;;  %v2457_v8 = vpack.c.bf16 %v2393_v38, %v2393_v38  ;;  %v2459_v52 = vpack.c.bf16 %v2395_v41, %v2395_v41  ;;  %v6128_v35 = vld [vmem:[%s8287_s3 + $0x78] sm:$0xff]  }
  0xff   :  { %2324 = vmatprep.subr.bf16.mxu0 %v5484_v36  ;;  %2365 = vmatprep.subr.bf16.mxu1 %v5486_v40  ;;  %v6129_v40 = vld [vmem:[%s8287_s3 + $0xf8] sm:$0xff]  }
 0x102   :  { %2325 = vmatpush1.bf16.msra.mxu0 %v5483_v42  ;;  %2366 = vmatpush1.bf16.msra.mxu1 %v5485_v43  ;;  %v6130_v42 = vld [vmem:[%s8287_s3 + $0x38] sm:$0xff]  }
 0x103   :  { %5744 = vmatprep.subr.bf16.mxu0 %v6100_v44  ;;  %5766 = vmatprep.subr.bf16.mxu1 %v6101_v45  ;;  %v6131_v43 = vld [vmem:[%s8287_s3 + $0xb8] sm:$0xff]   ;;  %v6132_v44 = vld [vmem:[%s8287_s3 + $0x140] sm:$0xff]  }
 0x104   :  { %v6133_v45 = vld [vmem:[%s8287_s3 + $0x1c0] sm:$0xff]  }
 0x105   :  { %2343 = vmatmul.mubr.bf16.vlgmr.msra.gmra.mrb[28].mxu0 %v6596_v11  ;;  %2384 = vmatmul.mubr.bf16.vlgmr.msra.gmra.mrb[28].mxu1 %v6596_v11  ;;  %v6110_v11 = vld [vmem:[%s8287_s3 + $0x10] sm:$0xff]  }
 0x106   :  { %5745 = vmatpush3.bf16.msra.mxu0 %v6102_v46  ;;  %4575 = vmatprep.mubr.bf16.mxu0 %v2457_v8  ;;  %v6134_v46 = vld [vmem:[%s8287_s3 + $0x100] sm:$0xff]   ;;  %v2456_v8 = vpack.c.bf16 %v7307_v31, %v7307_v31  ;;  %v6139_v31 = vld [vmem:[%s8287_s3 + $0x188] sm:$0xff]  }
 0x107   :  { %5767 = vmatpush3.bf16.msra.mxu1 %v6103_v47  ;;  %4615 = vmatprep.mubr.bf16.mxu1 %v2459_v52  ;;  %v6135_v47 = vld [vmem:[%s8287_s3 + $0x180] sm:$0xff]   ;;  %v6137_v52 = vld [vmem:[%s8287_s3 + $0x1c8] sm:$0xff]  }
 0x108   :  { %5746 = vmatprep.subr.bf16.mxu0 %v6104_v48  ;;  %5768 = vmatprep.subr.bf16.mxu1 %v6105_v50  ;;  %v6136_v48 = vld [vmem:[%s8287_s3 + $0x148] sm:$0xff]   ;;  %v2458_v50 = vpack.c.bf16 %v7309_v37, %v7309_v37  ;;  %v6140_v37 = vld [vmem:[%s8287_s3 + $0x150] sm:$0xff]  }
 0x10a   :  { %5747 = vmatpush3.bf16.msra.mxu0 %v6106_v51 }
 0x10b   :  { %5769 = vmatpush3.bf16.msra.mxu1 %v6107_v53  ;;  %5748 = vmatprep.subr.bf16.mxu0 %v6108_v54  ;;  %v6138_v53 = vld [vmem:[%s8287_s3 + $0x108] sm:$0xff]  }
 0x10c   :  { %5770 = vmatprep.subr.bf16.mxu1 %v6109_v56  ;;  %v6141_v56 = vld [vmem:[%s8287_s3 + $0x1d0] sm:$0xff]  }
 0x10e   :  { %5749 = vmatpush3.bf16.msra.mxu0 %v6110_v11  ;;  %v6142_v11 = vld [vmem:[%s8287_s3 + $0x110] sm:$0xff]  }
 0x10f   :  { %5771 = vmatpush3.bf16.msra.mxu1 %v6111_v57  ;;  %5750 = vmatprep.subr.bf16.mxu0 %v6112_v58  ;;  %v6143_v57 = vld [vmem:[%s8287_s3 + $0x190] sm:$0xff]   ;;  %v6144_v58 = vld [vmem:[%s8287_s3 + $0x158] sm:$0xff]  }
 0x110   :  { %5772 = vmatprep.subr.bf16.mxu1 %v6113_v61  ;;  %v6145_v61 = vld [vmem:[%s8287_s3 + $0x1d8] sm:$0xff]  }
 0x112   :  { %5751 = vmatpush3.bf16.msra.mxu0 %v6114_v62  ;;  %v6146_v62 = vld [vmem:[%s8287_s3 + $0x118] sm:$0xff]  }
 0x113   :  { %5773 = vmatpush3.bf16.msra.mxu1 %v6115_v0  ;;  %5752 = vmatprep.subr.bf16.mxu0 %v6116_v1  ;;  %v6147_v0 = vld [vmem:[%s8287_s3 + $0x198] sm:$0xff]   ;;  %v6148_v1 = vld [vmem:[%s8287_s3 + $0x160] sm:$0xff]  }
 0x114   :  { %5774 = vmatprep.subr.bf16.mxu1 %v6117_v3  ;;  %v6149_v3 = vld [vmem:[%s8287_s3 + $0x1e0] sm:$0xff]  }
 0x116   :  { %5753 = vmatpush3.bf16.msra.mxu0 %v6118_v4  ;;  %v6150_v4 = vld [vmem:[%s8287_s3 + $0x120] sm:$0xff]  }
 0x117   :  { %5775 = vmatpush3.bf16.msra.mxu1 %v6119_v6  ;;  %5754 = vmatprep.subr.bf16.mxu0 %v6120_v12  ;;  %v6151_v6 = vld [vmem:[%s8287_s3 + $0x1a0] sm:$0xff]   ;;  %v7504_v12 = vld [vmem:[%s8286_s2 + $0x8] sm:$0xff] }
 0x118   :  { %v1852_v20 = vpop.f32.mrb[4].mxu0  ;;  %5776 = vmatprep.subr.bf16.mxu1 %v6121_v13  ;;  %v1893_v23 = vpop.f32.mrb[4].mxu1  ;;  %v6152_v13 = vld [vmem:[%s8287_s3 + $0x168] sm:$0xff]  }
 0x119   :  { %v1853_v22 = vadd.f32 %v1852_v20, %v315_v15  ;;  %v1854_v24 = vpop.f32.mrb[5].mxu0  ;;  %v1894_v25 = vadd.f32 %v1893_v23, %v323_v16  ;;  %v1895_v27 = vpop.f32.mrb[5].mxu1  ;;  %v6154_v15 = vld [vmem:[%s8287_s3 + $0x128] sm:$0xff]   ;;  %v339_v16 = vrot.slane %v7504_v12, %v7270_v63  ;;  %v6156_v20 = vld [vmem:[%s8287_s3 + $0x170] sm:$0xff]  }
 0x11a   :  { %v1855_v26 = vadd.f32 %v1854_v24, %v319_v17  ;;  %v1856_v28 = vpop.f32.mrb[6].mxu0  ;;  %5755 = vmatpush3.bf16.msra.mxu0 %v6122_v14  ;;  %v1896_v32 = vadd.f32 %v1895_v27, %v327_v19  ;;  %v1897_v33 = vpop.f32.mrb[6].mxu1  ;;  %v6153_v14 = vld [vmem:[%s8287_s3 + $0x1e8] sm:$0xff]   ;;  %v335_v17 = vrot.slane %v7504_v12, %v7264_v60  ;;  %v343_v19 = vrot.slane %v7504_v12, %v7276_v2 }
 0x11b   :  { %v7419_v30 = vmax.f32 %v1853_v22, 0.0  ;;  %5777 = vmatpush3.bf16.msra.mxu1 %v6123_v49  ;;  %v1857_v34 = vpop.f32.mrb[7].mxu0  ;;  %5756 = vmatprep.subr.bf16.mxu0 %v6124_v18  ;;  %v7424_v36 = vmax.f32 %v1894_v25, 0.0  ;;  %v1898_v39 = vpop.f32.mrb[7].mxu1  ;;  %v331_v49 = vrot.slane %v7504_v12, %v7250_v55  ;;  %v6155_v18 = vld [vmem:[%s8287_s3 + $0x1a8] sm:$0xff]   ;;  %v6157_v22 = vld [vmem:[%s8287_s3 + $0x1f0] sm:$0xff]  }
 0x11c   :  { %v2397_v38 = vmax.f32 %v1855_v26, 0.0  ;;  %5778 = vmatprep.subr.bf16.mxu1 %v6125_v21  ;;  %v2399_v41 = vmax.f32 %v1896_v32, 0.0  ;;  %v6159_v32 = vld [vmem:[%s8287_s3 + $0x1b0] sm:$0xff]   ;;  %v6160_v39 = vld [vmem:[%s8287_s3 + $0x178] sm:$0xff]  }
 0x11d   :  { %2428 = vst [vmem:[#allocation3 + $0x20] sm:$0xff] %v7419_v30  ;;  %2430 = vst [vmem:[#allocation3 + $0x30] sm:$0xff] %v7424_v36 }
 0x11e   :  { %2429 = vst [vmem:[#allocation3 + $0x28] sm:$0xff] %v2397_v38  ;;  %5757 = vmatpush3.bf16.msra.mxu0 %v6126_v29  ;;  %2431 = vst [vmem:[#allocation3 + $0x38] sm:$0xff] %v2399_v41  ;;  %v2461_v51 = vpack.c.bf16 %v2397_v38, %v2397_v38  ;;  %v2463_v54 = vpack.c.bf16 %v2399_v41, %v2399_v41 }
 0x11f   :  { %5779 = vmatpush3.bf16.msra.mxu1 %v6127_v59  ;;  %5758 = vmatprep.subr.bf16.mxu0 %v6128_v35  ;;  %v6158_v59 = vld [vmem:[%s8287_s3 + $0x130] sm:$0xff]  }
 0x120   :  { %5780 = vmatprep.subr.bf16.mxu1 %v6129_v40 }
 0x122   :  { %5759 = vmatpush3.bf16.msra.mxu0 %v6130_v42 }
 0x123   :  { %5781 = vmatpush3.bf16.msra.mxu1 %v6131_v43  ;;  %5788 = vmatprep.subr.bf16.mxu0 %v6132_v44  ;;  %v6161_v43 = vld [vmem:[%s8287_s3 + $0x1f8] sm:$0xff]  }
 0x124   :  { %5810 = vmatprep.subr.bf16.mxu1 %v6133_v45  ;;  %v6162_v45 = vld [vmem:[%s8287_s3 + $0x138] sm:$0xff]  }
 0x125   :  { %4576 = vmatmul.mubr.bf16.vlgmr.msra.gmra.mrb[32].mxu0 %v2456_v8  ;;  %v6166_v8 = vld [vmem:[%s8287_s3 + $0x200] sm:$0xff]  }
 0x126   :  { %4616 = vmatmul.mubr.bf16.vlgmr.msra.gmra.mrb[32].mxu1 %v2458_v50  ;;  %5789 = vmatpush3.bf16.msra.mxu0 %v6134_v46  ;;  %v6163_v46 = vld [vmem:[%s8287_s3 + $0x1b8] sm:$0xff]   ;;  %v6167_v50 = vld [vmem:[%s8287_s3 + $0x280] sm:$0xff]  }
 0x127   :  { %4655 = vmatprep.mubr.bf16.mxu0 %v2461_v51  ;;  %5811 = vmatpush3.bf16.msra.mxu1 %v6135_v47  ;;  %v6164_v47 = vld [vmem:[%s8287_s3 + $0x240] sm:$0xff]   ;;  %v6168_v51 = vld [vmem:[%s8287_s3 + $0x248] sm:$0xff]  }
 0x128   :  { %4695 = vmatprep.mubr.bf16.mxu1 %v2463_v54  ;;  %5790 = vmatprep.subr.bf16.mxu0 %v6136_v48  ;;  %v6165_v48 = vld [vmem:[%s8287_s3 + $0x2c0] sm:$0xff]  }
 0x129   :  { %5812 = vmatprep.subr.bf16.mxu1 %v6137_v52  ;;  %v2460_v52 = vpack.c.bf16 %v7419_v30, %v7419_v30  ;;  %v6171_v30 = vld [vmem:[%s8287_s3 + $0x288] sm:$0xff]  }
 0x12a   :  { %5791 = vmatpush3.bf16.msra.mxu0 %v6138_v53  ;;  %v2462_v53 = vpack.c.bf16 %v7424_v36, %v7424_v36  ;;  %v6172_v36 = vld [vmem:[%s8287_s3 + $0x250] sm:$0xff]  }
 0x12b   :  { %5813 = vmatpush3.bf16.msra.mxu1 %v6139_v31  ;;  %5792 = vmatprep.subr.bf16.mxu0 %v6140_v37  ;;  %v6169_v31 = vld [vmem:[%s8287_s3 + $0x2c8] sm:$0xff]  }
 0x12c   :  { %5814 = vmatprep.subr.bf16.mxu1 %v6141_v56  ;;  %v6170_v37 = vld [vmem:[%s8287_s3 + $0x208] sm:$0xff]  }
 0x12e   :  { %5793 = vmatpush3.bf16.msra.mxu0 %v6142_v11  ;;  %v6173_v11 = vld [vmem:[%s8287_s3 + $0x2d0] sm:$0xff]  }
 0x12f   :  { %5815 = vmatpush3.bf16.msra.mxu1 %v6143_v57  ;;  %5794 = vmatprep.subr.bf16.mxu0 %v6144_v58  ;;  %v6174_v57 = vld [vmem:[%s8287_s3 + $0x210] sm:$0xff]  }
 0x130   :  { %5816 = vmatprep.subr.bf16.mxu1 %v6145_v61  ;;  %v6175_v58 = vld [vmem:[%s8287_s3 + $0x290] sm:$0xff]   ;;  %v6176_v61 = vld [vmem:[%s8287_s3 + $0x258] sm:$0xff]  }
 0x132   :  { %5795 = vmatpush3.bf16.msra.mxu0 %v6146_v62  ;;  %v6177_v62 = vld [vmem:[%s8287_s3 + $0x2d8] sm:$0xff]  }
 0x133   :  { %5817 = vmatpush3.bf16.msra.mxu1 %v6147_v0  ;;  %5796 = vmatprep.subr.bf16.mxu0 %v6148_v1 }
 0x134   :  { %5818 = vmatprep.subr.bf16.mxu1 %v6149_v3 }
 0x136   :  { %5797 = vmatpush3.bf16.msra.mxu0 %v6150_v4 }
 0x137   :  { %5819 = vmatpush3.bf16.msra.mxu1 %v6151_v6  ;;  %5798 = vmatprep.subr.bf16.mxu0 %v6152_v13 }
 0x138   :  { %v1934_v21 = vpop.f32.mrb[8].mxu0  ;;  %5820 = vmatprep.subr.bf16.mxu1 %v6153_v14  ;;  %v1975_v24 = vpop.f32.mrb[8].mxu1 }
 0x139   :  { %v1935_v23 = vadd.f32 %v1934_v21, %v331_v49  ;;  %v1936_v25 = vpop.f32.mrb[9].mxu0  ;;  %v1976_v26 = vadd.f32 %v1975_v24, %v339_v16  ;;  %v1977_v28 = vpop.f32.mrb[9].mxu1 }
 0x13a   :  { %v1937_v27 = vadd.f32 %v1936_v25, %v335_v17  ;;  %v1938_v29 = vpop.f32.mrb[10].mxu0  ;;  %5799 = vmatpush3.bf16.msra.mxu0 %v6154_v15  ;;  %v1978_v34 = vadd.f32 %v1977_v28, %v343_v19  ;;  %v1979_v35 = vpop.f32.mrb[10].mxu1 }
 0x13b   :  { %v7538_v33 = vmax.f32 %v1935_v23, 0.0  ;;  %5821 = vmatpush3.bf16.msra.mxu1 %v6155_v18  ;;  %v1939_v38 = vpop.f32.mrb[11].mxu0  ;;  %5800 = vmatprep.subr.bf16.mxu0 %v6156_v20  ;;  %v7543_v40 = vmax.f32 %v1976_v26, 0.0  ;;  %v1980_v42 = vpop.f32.mrb[11].mxu1 }
 0x13c   :  { %v2401_v41 = vmax.f32 %v1937_v27, 0.0  ;;  %5822 = vmatprep.subr.bf16.mxu1 %v6157_v22  ;;  %v2403_v44 = vmax.f32 %v1978_v34, 0.0 }
 0x13d   :  { %2432 = vst [vmem:[#allocation3 + $0x40] sm:$0xff] %v7538_v33  ;;  %2434 = vst [vmem:[#allocation3 + $0x50] sm:$0xff] %v7543_v40 }
 0x13e   :  { %2433 = vst [vmem:[#allocation3 + $0x48] sm:$0xff] %v2401_v41  ;;  %5801 = vmatpush3.bf16.msra.mxu0 %v6158_v59  ;;  %2435 = vst [vmem:[#allocation3 + $0x58] sm:$0xff] %v2403_v44  ;;  %v2465_v54 = vpack.c.bf16 %v2401_v41, %v2401_v41  ;;  %v2467_v56 = vpack.c.bf16 %v2403_v44, %v2403_v44 }
 0x13f   :  { %5823 = vmatpush3.bf16.msra.mxu1 %v6159_v32  ;;  %5802 = vmatprep.subr.bf16.mxu0 %v6160_v39 }
 0x140   :  { %5824 = vmatprep.subr.bf16.mxu1 %v6161_v43 }
 0x142   :  { %5803 = vmatpush3.bf16.msra.mxu0 %v6162_v45 }
 0x143   :  { %5825 = vmatpush3.bf16.msra.mxu1 %v6163_v46  ;;  %5832 = vmatprep.subr.bf16.mxu0 %v6164_v47 }
 0x144   :  { %5854 = vmatprep.subr.bf16.mxu1 %v6165_v48 }
 0x145   :  { %4656 = vmatmul.mubr.bf16.vlgmr.msra.gmra.mrb[36].mxu0 %v2460_v52 }
 0x146   :  { %4696 = vmatmul.mubr.bf16.vlgmr.msra.gmra.mrb[36].mxu1 %v2462_v53  ;;  %5833 = vmatpush3.bf16.msra.mxu0 %v6166_v8 }
 0x147   :  { %4735 = vmatprep.mubr.bf16.mxu0 %v2465_v54  ;;  %5855 = vmatpush3.bf16.msra.mxu1 %v6167_v50 }
 0x148   :  { %4775 = vmatprep.mubr.bf16.mxu1 %v2467_v56  ;;  %5834 = vmatprep.subr.bf16.mxu0 %v6168_v51 }
 0x149   :  { %5856 = vmatprep.subr.bf16.mxu1 %v6169_v31 }
 0x14a   :  { %5835 = vmatpush3.bf16.msra.mxu0 %v6170_v37 }
 0x14b   :  { %5857 = vmatpush3.bf16.msra.mxu1 %v6171_v30  ;;  %5836 = vmatprep.subr.bf16.mxu0 %v6172_v36 }
 0x14c   :  { %5858 = vmatprep.subr.bf16.mxu1 %v6173_v11 }
 0x14d   :  { %16 = vsyncpa [#allocation6], 0  ;;  %v6178_v0 = vld [vmem:[%s8287_s3 + $0x218] sm:$0xff]   ;;  %v6180_v3 = vld [vmem:[%s8287_s3 + $0x260] sm:$0xff]   ;;  %v347_v49 = vrot.slane %v7504_v12, %v7373_v5  ;;  %v355_v16 = vrot.slane %v7504_v12, %v7379_v7  ;;  %v351_v17 = vrot.slane %v7504_v12, %v7382_v9  ;;  %v359_v19 = vrot.slane %v7504_v12, %v7385_v10 }
 0x14e   :  { %5837 = vmatpush3.bf16.msra.mxu0 %v6174_v57  ;;  %v6179_v1 = vld [vmem:[%s8287_s3 + $0x298] sm:$0xff]   ;;  %v6181_v4 = vld [vmem:[%s8287_s3 + $0x2e0] sm:$0xff]   ;;  %v6184_v14 = vld [vmem:[%s8287_s3 + $0x268] sm:$0xff]   ;;  %v2464_v52 = vpack.c.bf16 %v7538_v33, %v7538_v33  ;;  %v2466_v54 = vpack.c.bf16 %v7543_v40, %v7543_v40 }
 0x14f   :  { %5859 = vmatpush3.bf16.msra.mxu1 %v6175_v58  ;;  %5838 = vmatprep.subr.bf16.mxu0 %v6176_v61  ;;  %v6182_v6 = vld [vmem:[%s8287_s3 + $0x220] sm:$0xff]   ;;  %v6185_v15 = vld [vmem:[%s8287_s3 + $0x2e8] sm:$0xff]   ;;  %v6188_v21 = vld [vmem:[%s8287_s3 + $0x270] sm:$0xff]  }
 0x150   :  { %5860 = vmatprep.subr.bf16.mxu1 %v6177_v62  ;;  %v6183_v13 = vld [vmem:[%s8287_s3 + $0x2a0] sm:$0xff]   ;;  %v6186_v18 = vld [vmem:[%s8287_s3 + $0x228] sm:$0xff]   ;;  %v6189_v23 = vld [vmem:[%s8287_s3 + $0x2f0] sm:$0xff]  }
 0x151   :  { %v6187_v20 = vld [vmem:[%s8287_s3 + $0x2a8] sm:$0xff]   ;;  %v6190_v59 = vld [vmem:[%s8287_s3 + $0x230] sm:$0xff]   ;;  %v6192_v41 = vld [vmem:[%s8287_s3 + $0x278] sm:$0xff]  }
 0x152   :  { %5839 = vmatpush3.bf16.msra.mxu0 %v6178_v0  ;;  %v6191_v39 = vld [vmem:[%s8287_s3 + $0x2b0] sm:$0xff]   ;;  %v6193_v45 = vld [vmem:[%s8287_s3 + $0x2f8] sm:$0xff]   ;;  %v6196_v8 = vld [vmem:[%s8287_s3 + $0x340] sm:$0xff]  }
 0x153   :  { %5861 = vmatpush3.bf16.msra.mxu1 %v6179_v1  ;;  %5840 = vmatprep.subr.bf16.mxu0 %v6180_v3  ;;  %v6194_v47 = vld [vmem:[%s8287_s3 + $0x238] sm:$0xff]   ;;  %v6197_v50 = vld [vmem:[%s8287_s3 + $0x3c0] sm:$0xff]   ;;  %v6200_v31 = vld [vmem:[%s8287_s3 + $0x348] sm:$0xff]  }
 0x154   :  { %5862 = vmatprep.subr.bf16.mxu1 %v6181_v4  ;;  %v6195_v48 = vld [vmem:[%s8287_s3 + $0x2b8] sm:$0xff]   ;;  %v6198_v51 = vld [vmem:[%s8287_s3 + $0x300] sm:$0xff]   ;;  %v6201_v33 = vld [vmem:[%s8287_s3 + $0x3c8] sm:$0xff]  }
 0x155   :  { %v6199_v53 = vld [vmem:[%s8287_s3 + $0x380] sm:$0xff]   ;;  %v6202_v30 = vld [vmem:[%s8287_s3 + $0x308] sm:$0xff]   ;;  %v6204_v36 = vld [vmem:[%s8287_s3 + $0x350] sm:$0xff]  }
 0x156   :  { %5841 = vmatpush3.bf16.msra.mxu0 %v6182_v6  ;;  %v6203_v40 = vld [vmem:[%s8287_s3 + $0x388] sm:$0xff]   ;;  %v6205_v11 = vld [vmem:[%s8287_s3 + $0x3d0] sm:$0xff]   ;;  %v6208_v61 = vld [vmem:[%s8287_s3 + $0x358] sm:$0xff]  }
 0x157   :  { %5863 = vmatpush3.bf16.msra.mxu1 %v6183_v13  ;;  %5842 = vmatprep.subr.bf16.mxu0 %v6184_v14  ;;  %v6206_v57 = vld [vmem:[%s8287_s3 + $0x310] sm:$0xff]   ;;  %v6209_v62 = vld [vmem:[%s8287_s3 + $0x3d8] sm:$0xff]   ;;  %v6212_v3 = vld [vmem:[%s8287_s3 + $0x360] sm:$0xff]  }
 0x158   :  { %v2016_v22 = vpop.f32.mrb[12].mxu0  ;;  %5864 = vmatprep.subr.bf16.mxu1 %v6185_v15  ;;  %v2057_v25 = vpop.f32.mrb[12].mxu1  ;;  %v6207_v58 = vld [vmem:[%s8287_s3 + $0x390] sm:$0xff]   ;;  %v6210_v0 = vld [vmem:[%s8287_s3 + $0x318] sm:$0xff]   ;;  %v6213_v4 = vld [vmem:[%s8287_s3 + $0x3e0] sm:$0xff]  }
 0x159   :  { %v2017_v24 = vadd.f32 %v2016_v22, %v347_v49  ;;  %v2018_v26 = vpop.f32.mrb[13].mxu0  ;;  %v2058_v27 = vadd.f32 %v2057_v25, %v355_v16  ;;  %v2059_v28 = vpop.f32.mrb[13].mxu1  ;;  %v6211_v1 = vld [vmem:[%s8287_s3 + $0x398] sm:$0xff]   ;;  %v6214_v6 = vld [vmem:[%s8287_s3 + $0x320] sm:$0xff]   ;;  %v7734_v13 = vld [vmem:[%s8286_s2 + $0x10] sm:$0xff] }
 0x15a   :  { %v2019_v12 = vadd.f32 %v2018_v26, %v351_v17  ;;  %v2020_v29 = vpop.f32.mrb[14].mxu0  ;;  %5843 = vmatpush3.bf16.msra.mxu0 %v6186_v18  ;;  %v2060_v34 = vadd.f32 %v2059_v28, %v359_v19  ;;  %v2061_v35 = vpop.f32.mrb[14].mxu1  ;;  %v6215_v14 = vld [vmem:[%s8287_s3 + $0x3a0] sm:$0xff]   ;;  %v6216_v15 = vld [vmem:[%s8287_s3 + $0x368] sm:$0xff]   ;;  %v363_v16 = vrot.slane %v7734_v13, %v7250_v55  ;;  %v371_v17 = vrot.slane %v7734_v13, %v7270_v63  ;;  %v6220_v22 = vld [vmem:[%s8287_s3 + $0x370] sm:$0xff]  }
 0x15b   :  { %v7649_v32 = vmax.f32 %v2017_v24, 0.0  ;;  %5865 = vmatpush3.bf16.msra.mxu1 %v6187_v20  ;;  %v2021_v38 = vpop.f32.mrb[15].mxu0  ;;  %5844 = vmatprep.subr.bf16.mxu0 %v6188_v21  ;;  %v7657_v42 = vmax.f32 %v2058_v27, 0.0  ;;  %v2062_v44 = vpop.f32.mrb[15].mxu1  ;;  %v6217_v49 = vld [vmem:[%s8287_s3 + $0x3e8] sm:$0xff]   ;;  %v367_v18 = vrot.slane %v7734_v13, %v7264_v60  ;;  %v375_v20 = vrot.slane %v7734_v13, %v7276_v2  ;;  %v6221_v24 = vld [vmem:[%s8287_s3 + $0x3f0] sm:$0xff]  }
 0x15c   :  { %v2405_v43 = vmax.f32 %v2019_v12, 0.0  ;;  %5866 = vmatprep.subr.bf16.mxu1 %v6189_v23  ;;  %v2407_v46 = vmax.f32 %v2060_v34, 0.0  ;;  %v6218_v19 = vld [vmem:[%s8287_s3 + $0x328] sm:$0xff]   ;;  %v6222_v34 = vld [vmem:[%s8287_s3 + $0x330] sm:$0xff]   ;;  %v6224_v44 = vld [vmem:[%s8287_s3 + $0x378] sm:$0xff]  }
 0x15d   :  { %2436 = vst [vmem:[#allocation3 + $0x60] sm:$0xff] %v7649_v32  ;;  %2438 = vst [vmem:[#allocation3 + $0x70] sm:$0xff] %v7657_v42  ;;  %v6219_v21 = vld [vmem:[%s8287_s3 + $0x3a8] sm:$0xff]  }
 0x15e   :  { %2437 = vst [vmem:[#allocation3 + $0x68] sm:$0xff] %v2405_v43  ;;  %5845 = vmatpush3.bf16.msra.mxu0 %v6190_v59  ;;  %2439 = vst [vmem:[#allocation3 + $0x78] sm:$0xff] %v2407_v46  ;;  %v2469_v37 = vpack.c.bf16 %v2405_v43, %v2405_v43  ;;  %v2471_v56 = vpack.c.bf16 %v2407_v46, %v2407_v46  ;;  %v6223_v43 = vld [vmem:[%s8287_s3 + $0x3b0] sm:$0xff]  }
 0x15f   :  { %5867 = vmatpush3.bf16.msra.mxu1 %v6191_v39  ;;  %5846 = vmatprep.subr.bf16.mxu0 %v6192_v41 }
 0x160   :  { %5868 = vmatprep.subr.bf16.mxu1 %v6193_v45 }
 0x162   :  { %5847 = vmatpush3.bf16.msra.mxu0 %v6194_v47 }
 0x163   :  { %5869 = vmatpush3.bf16.msra.mxu1 %v6195_v48  ;;  %5876 = vmatprep.subr.bf16.mxu0 %v6196_v8  ;;  %v6225_v48 = vld [vmem:[%s8287_s3 + $0x3f8] sm:$0xff]  }
 0x164   :  { %5898 = vmatprep.subr.bf16.mxu1 %v6197_v50  ;;  %v6226_v50 = vld [vmem:[%s8287_s3 + $0x338] sm:$0xff]  }
 0x165   :  { %4736 = vmatmul.mubr.bf16.vlgmr.msra.gmra.mrb[40].mxu0 %v2464_v52  ;;  %v6228_v52 = vld [vmem:[%s8287_s3 + $0x440] sm:$0xff]  }
 0x166   :  { %4776 = vmatmul.mubr.bf16.vlgmr.msra.gmra.mrb[40].mxu1 %v2466_v54  ;;  %5877 = vmatpush3.bf16.msra.mxu0 %v6198_v51  ;;  %v6227_v51 = vld [vmem:[%s8287_s3 + $0x3b8] sm:$0xff]   ;;  %v6230_v54 = vld [vmem:[%s8287_s3 + $0x400] sm:$0xff]  }
 0x167   :  { %4815 = vmatprep.mubr.bf16.mxu0 %v2469_v37  ;;  %5899 = vmatpush3.bf16.msra.mxu1 %v6199_v53  ;;  %v6229_v53 = vld [vmem:[%s8287_s3 + $0x4c0] sm:$0xff]  }
 0x168   :  { %4855 = vmatprep.mubr.bf16.mxu1 %v2471_v56  ;;  %5878 = vmatprep.subr.bf16.mxu0 %v6200_v31  ;;  %v2468_v31 = vpack.c.bf16 %v7649_v32, %v7649_v32  ;;  %v6231_v37 = vld [vmem:[%s8287_s3 + $0x480] sm:$0xff]   ;;  %v6232_v56 = vld [vmem:[%s8287_s3 + $0x448] sm:$0xff]  }
 0x169   :  { %5900 = vmatprep.subr.bf16.mxu1 %v6201_v33  ;;  %v2470_v33 = vpack.c.bf16 %v7657_v42, %v7657_v42  ;;  %v6233_v32 = vld [vmem:[%s8287_s3 + $0x4c8] sm:$0xff]  }
 0x16a   :  { %5879 = vmatpush3.bf16.msra.mxu0 %v6202_v30  ;;  %v6235_v42 = vld [vmem:[%s8287_s3 + $0x488] sm:$0xff]  }
 0x16b   :  { %5901 = vmatpush3.bf16.msra.mxu1 %v6203_v40  ;;  %5880 = vmatprep.subr.bf16.mxu0 %v6204_v36  ;;  %v6234_v36 = vld [vmem:[%s8287_s3 + $0x408] sm:$0xff]  }
 0x16c   :  { %5902 = vmatprep.subr.bf16.mxu1 %v6205_v11  ;;  %v6236_v11 = vld [vmem:[%s8287_s3 + $0x450] sm:$0xff]  }
 0x16e   :  { %5881 = vmatpush3.bf16.msra.mxu0 %v6206_v57  ;;  %v6237_v57 = vld [vmem:[%s8287_s3 + $0x4d0] sm:$0xff]  }
 0x16f   :  { %5903 = vmatpush3.bf16.msra.mxu1 %v6207_v58  ;;  %5882 = vmatprep.subr.bf16.mxu0 %v6208_v61  ;;  %v6238_v58 = vld [vmem:[%s8287_s3 + $0x410] sm:$0xff]  }
 0x170   :  { %5904 = vmatprep.subr.bf16.mxu1 %v6209_v62  ;;  %v6239_v61 = vld [vmem:[%s8287_s3 + $0x490] sm:$0xff]   ;;  %v6240_v62 = vld [vmem:[%s8287_s3 + $0x458] sm:$0xff]  }
 0x172   :  { %5883 = vmatpush3.bf16.msra.mxu0 %v6210_v0  ;;  %v6241_v0 = vld [vmem:[%s8287_s3 + $0x4d8] sm:$0xff]  }
 0x173   :  { %5905 = vmatpush3.bf16.msra.mxu1 %v6211_v1  ;;  %5884 = vmatprep.subr.bf16.mxu0 %v6212_v3  ;;  %v6242_v1 = vld [vmem:[%s8287_s3 + $0x418] sm:$0xff]  }
 0x174   :  { %5906 = vmatprep.subr.bf16.mxu1 %v6213_v4  ;;  %v6243_v3 = vld [vmem:[%s8287_s3 + $0x498] sm:$0xff]   ;;  %v6244_v4 = vld [vmem:[%s8287_s3 + $0x460] sm:$0xff]  }
 0x176   :  { %5885 = vmatpush3.bf16.msra.mxu0 %v6214_v6  ;;  %v6245_v6 = vld [vmem:[%s8287_s3 + $0x4e0] sm:$0xff]  }
 0x177   :  { %5907 = vmatpush3.bf16.msra.mxu1 %v6215_v14  ;;  %5886 = vmatprep.subr.bf16.mxu0 %v6216_v15  ;;  %v6246_v14 = vld [vmem:[%s8287_s3 + $0x420] sm:$0xff]  }
 0x178   :  { %v2098_v23 = vpop.f32.mrb[16].mxu0  ;;  %5908 = vmatprep.subr.bf16.mxu1 %v6217_v49  ;;  %v2139_v26 = vpop.f32.mrb[16].mxu1  ;;  %v6247_v15 = vld [vmem:[%s8287_s3 + $0x4a0] sm:$0xff]   ;;  %v6248_v49 = vld [vmem:[%s8287_s3 + $0x468] sm:$0xff]  }
 0x179   :  { %v2099_v25 = vadd.f32 %v2098_v23, %v363_v16  ;;  %v2100_v27 = vpop.f32.mrb[17].mxu0  ;;  %v2140_v12 = vadd.f32 %v2139_v26, %v371_v17  ;;  %v2141_v29 = vpop.f32.mrb[17].mxu1  ;;  %v6249_v16 = vld [vmem:[%s8287_s3 + $0x4e8] sm:$0xff]   ;;  %v379_v17 = vrot.slane %v7734_v13, %v7373_v5  ;;  %v6252_v23 = vld [vmem:[%s8287_s3 + $0x470] sm:$0xff]  }
 0x17a   :  { %v2101_v28 = vadd.f32 %v2100_v27, %v367_v18  ;;  %v2102_v59 = vpop.f32.mrb[18].mxu0  ;;  %5887 = vmatpush3.bf16.msra.mxu0 %v6218_v19  ;;  %v2142_v38 = vadd.f32 %v2141_v29, %v375_v20  ;;  %v2143_v39 = vpop.f32.mrb[18].mxu1  ;;  %v387_v18 = vrot.slane %v7734_v13, %v7379_v7  ;;  %v383_v19 = vrot.slane %v7734_v13, %v7382_v9  ;;  %v6250_v20 = vld [vmem:[%s8287_s3 + $0x428] sm:$0xff]  }
 0x17b   :  { %v7768_v35 = vmax.f32 %v2099_v25, 0.0  ;;  %5909 = vmatpush3.bf16.msra.mxu1 %v6219_v21  ;;  %v2103_v41 = vpop.f32.mrb[19].mxu0  ;;  %5888 = vmatprep.subr.bf16.mxu0 %v6220_v22  ;;  %v7776_v45 = vmax.f32 %v2140_v12, 0.0  ;;  %v2144_v47 = vpop.f32.mrb[19].mxu1  ;;  %v391_v21 = vrot.slane %v7734_v13, %v7385_v10  ;;  %v6251_v22 = vld [vmem:[%s8287_s3 + $0x4a8] sm:$0xff]   ;;  %v6253_v25 = vld [vmem:[%s8287_s3 + $0x4f0] sm:$0xff]  }
 0x17c   :  { %v2409_v46 = vmax.f32 %v2101_v28, 0.0  ;;  %5910 = vmatprep.subr.bf16.mxu1 %v6221_v24  ;;  %v2411_v8 = vmax.f32 %v2142_v38, 0.0 }
 0x17d   :  { %2440 = vst [vmem:[#allocation3 + $0x80] sm:$0xff] %v7768_v35  ;;  %2442 = vst [vmem:[#allocation3 + $0x90] sm:$0xff] %v7776_v45 }
 0x17e   :  { %2441 = vst [vmem:[#allocation3 + $0x88] sm:$0xff] %v2409_v46  ;;  %5889 = vmatpush3.bf16.msra.mxu0 %v6222_v34  ;;  %2443 = vst [vmem:[#allocation3 + $0x98] sm:$0xff] %v2411_v8  ;;  %v2473_v30 = vpack.c.bf16 %v2409_v46, %v2409_v46  ;;  %v2475_v40 = vpack.c.bf16 %v2411_v8, %v2411_v8  ;;  %v6254_v34 = vld [vmem:[%s8287_s3 + $0x430] sm:$0xff]   ;;  %v6256_v46 = vld [vmem:[%s8287_s3 + $0x478] sm:$0xff]  }
 0x17f   :  { %5911 = vmatpush3.bf16.msra.mxu1 %v6223_v43  ;;  %5890 = vmatprep.subr.bf16.mxu0 %v6224_v44  ;;  %v6255_v44 = vld [vmem:[%s8287_s3 + $0x4b0] sm:$0xff]  }
 0x180   :  { %5912 = vmatprep.subr.bf16.mxu1 %v6225_v48 }
 0x182   :  { %5891 = vmatpush3.bf16.msra.mxu0 %v6226_v50  ;;  %v6257_v50 = vld [vmem:[%s8287_s3 + $0x4f8] sm:$0xff]  }
 0x183   :  { %5913 = vmatpush3.bf16.msra.mxu1 %v6227_v51  ;;  %5920 = vmatprep.subr.bf16.mxu0 %v6228_v52  ;;  %v6258_v52 = vld [vmem:[%s8287_s3 + $0x438] sm:$0xff]  }
 0x184   :  { %5942 = vmatprep.subr.bf16.mxu1 %v6229_v53  ;;  %v6259_v53 = vld [vmem:[%s8287_s3 + $0x4b8] sm:$0xff]  }
 0x185   :  { %4816 = vmatmul.mubr.bf16.vlgmr.msra.gmra.mrb[44].mxu0 %v2468_v31  ;;  %v6261_v31 = vld [vmem:[%s8287_s3 + $0x5c0] sm:$0xff]  }
 0x186   :  { %4856 = vmatmul.mubr.bf16.vlgmr.msra.gmra.mrb[44].mxu1 %v2470_v33  ;;  %5921 = vmatpush3.bf16.msra.mxu0 %v6230_v54  ;;  %v6260_v54 = vld [vmem:[%s8287_s3 + $0x540] sm:$0xff]   ;;  %v2472_v33 = vpack.c.bf16 %v7768_v35, %v7768_v35  ;;  %v6265_v35 = vld [vmem:[%s8287_s3 + $0x5c8] sm:$0xff]  }
 0x187   :  { %4895 = vmatprep.mubr.bf16.mxu0 %v2473_v30  ;;  %5943 = vmatpush3.bf16.msra.mxu1 %v6231_v37  ;;  %v6262_v37 = vld [vmem:[%s8287_s3 + $0x500] sm:$0xff]   ;;  %v2474_v30 = vpack.c.bf16 %v7776_v45, %v7776_v45  ;;  %v6267_v45 = vld [vmem:[%s8287_s3 + $0x588] sm:$0xff]  }
 0x188   :  { %4935 = vmatprep.mubr.bf16.mxu1 %v2475_v40  ;;  %5922 = vmatprep.subr.bf16.mxu0 %v6232_v56  ;;  %v6263_v56 = vld [vmem:[%s8287_s3 + $0x580] sm:$0xff]  }
 0x189   :  { %5944 = vmatprep.subr.bf16.mxu1 %v6233_v32  ;;  %v6264_v32 = vld [vmem:[%s8287_s3 + $0x548] sm:$0xff]  }
 0x18a   :  { %5923 = vmatpush3.bf16.msra.mxu0 %v6234_v36 }
 0x18b   :  { %5945 = vmatpush3.bf16.msra.mxu1 %v6235_v42  ;;  %5924 = vmatprep.subr.bf16.mxu0 %v6236_v11  ;;  %v6266_v42 = vld [vmem:[%s8287_s3 + $0x508] sm:$0xff]   ;;  %v6268_v11 = vld [vmem:[%s8287_s3 + $0x550] sm:$0xff]  }
 0x18c   :  { %5946 = vmatprep.subr.bf16.mxu1 %v6237_v57  ;;  %v6269_v57 = vld [vmem:[%s8287_s3 + $0x5d0] sm:$0xff]  }
 0x18e   :  { %5925 = vmatpush3.bf16.msra.mxu0 %v6238_v58  ;;  %v6270_v58 = vld [vmem:[%s8287_s3 + $0x510] sm:$0xff]  }
 0x18f   :  { %5947 = vmatpush3.bf16.msra.mxu1 %v6239_v61  ;;  %5926 = vmatprep.subr.bf16.mxu0 %v6240_v62  ;;  %v6271_v61 = vld [vmem:[%s8287_s3 + $0x590] sm:$0xff]   ;;  %v6272_v62 = vld [vmem:[%s8287_s3 + $0x558] sm:$0xff]  }
 0x190   :  { %5948 = vmatprep.subr.bf16.mxu1 %v6241_v0  ;;  %v6273_v0 = vld [vmem:[%s8287_s3 + $0x5d8] sm:$0xff]  }
 0x192   :  { %5927 = vmatpush3.bf16.msra.mxu0 %v6242_v1  ;;  %v6274_v1 = vld [vmem:[%s8287_s3 + $0x518] sm:$0xff]  }
 0x193   :  { %5949 = vmatpush3.bf16.msra.mxu1 %v6243_v3  ;;  %5928 = vmatprep.subr.bf16.mxu0 %v6244_v4  ;;  %v6275_v3 = vld [vmem:[%s8287_s3 + $0x598] sm:$0xff]   ;;  %v6276_v4 = vld [vmem:[%s8287_s3 + $0x560] sm:$0xff]  }
 0x194   :  { %5950 = vmatprep.subr.bf16.mxu1 %v6245_v6  ;;  %v6277_v6 = vld [vmem:[%s8287_s3 + $0x5e0] sm:$0xff]  }
 0x196   :  { %5929 = vmatpush3.bf16.msra.mxu0 %v6246_v14  ;;  %v6278_v14 = vld [vmem:[%s8287_s3 + $0x520] sm:$0xff]  }
 0x197   :  { %5951 = vmatpush3.bf16.msra.mxu1 %v6247_v15  ;;  %5930 = vmatprep.subr.bf16.mxu0 %v6248_v49  ;;  %v7967_v15 = vld [vmem:[%s8286_s2 + $0x18] sm:$0xff]  ;;  %v6279_v49 = vld [vmem:[%s8287_s3 + $0x5a0] sm:$0xff]  }
 0x198   :  { %v2180_v24 = vpop.f32.mrb[20].mxu0  ;;  %5952 = vmatprep.subr.bf16.mxu1 %v6249_v16  ;;  %v2221_v27 = vpop.f32.mrb[20].mxu1  ;;  %v6280_v16 = vld [vmem:[%s8287_s3 + $0x568] sm:$0xff]  }
 0x199   :  { %v2181_v26 = vadd.f32 %v2180_v24, %v379_v17  ;;  %v2182_v12 = vpop.f32.mrb[21].mxu0  ;;  %v2222_v28 = vadd.f32 %v2221_v27, %v387_v18  ;;  %v2223_v29 = vpop.f32.mrb[21].mxu1  ;;  %v6281_v17 = vld [vmem:[%s8287_s3 + $0x5e8] sm:$0xff]   ;;  %v395_v18 = vrot.slane %v7967_v15, %v7250_v55 }
 0x19a   :  { %v2183_v13 = vadd.f32 %v2182_v12, %v383_v19  ;;  %v2184_v59 = vpop.f32.mrb[22].mxu0  ;;  %5931 = vmatpush3.bf16.msra.mxu0 %v6250_v20  ;;  %v2224_v39 = vadd.f32 %v2223_v29, %v391_v21  ;;  %v2225_v41 = vpop.f32.mrb[22].mxu1  ;;  %v403_v19 = vrot.slane %v7967_v15, %v7270_v63  ;;  %v399_v20 = vrot.slane %v7967_v15, %v7264_v60  ;;  %v6282_v21 = vld [vmem:[%s8287_s3 + $0x528] sm:$0xff]   ;;  %v6284_v63 = vld [vmem:[%s8287_s3 + $0x570] sm:$0xff]  }
 0x19b   :  { %v7882_v38 = vmax.f32 %v2181_v26, 0.0  ;;  %5953 = vmatpush3.bf16.msra.mxu1 %v6251_v22  ;;  %v2185_v43 = vpop.f32.mrb[23].mxu0  ;;  %5932 = vmatprep.subr.bf16.mxu0 %v6252_v23  ;;  %v7890_v47 = vmax.f32 %v2222_v28, 0.0  ;;  %v2226_v8 = vpop.f32.mrb[23].mxu1  ;;  %v407_v22 = vrot.slane %v7967_v15, %v7276_v2  ;;  %v6283_v55 = vld [vmem:[%s8287_s3 + $0x5a8] sm:$0xff]   ;;  %v6285_v60 = vld [vmem:[%s8287_s3 + $0x5f0] sm:$0xff]  }
 0x19c   :  { %v2413_v48 = vmax.f32 %v2183_v13, 0.0  ;;  %5954 = vmatprep.subr.bf16.mxu1 %v6253_v25  ;;  %v2415_v51 = vmax.f32 %v2224_v39, 0.0  ;;  %v6286_v13 = vld [vmem:[%s8287_s3 + $0x530] sm:$0xff]   ;;  %v6288_v43 = vld [vmem:[%s8287_s3 + $0x578] sm:$0xff]  }
 0x19d   :  { %2444 = vst [vmem:[#allocation3 + $0xa0] sm:$0xff] %v7882_v38  ;;  %2446 = vst [vmem:[#allocation3 + $0xb0] sm:$0xff] %v7890_v47  ;;  %v6287_v41 = vld [vmem:[%s8287_s3 + $0x5b0] sm:$0xff]   ;;  %v6289_v8 = vld [vmem:[%s8287_s3 + $0x5f8] sm:$0xff]  }
 0x19e   :  { %2445 = vst [vmem:[#allocation3 + $0xa8] sm:$0xff] %v2413_v48  ;;  %5933 = vmatpush3.bf16.msra.mxu0 %v6254_v34  ;;  %2447 = vst [vmem:[#allocation3 + $0xb8] sm:$0xff] %v2415_v51  ;;  %v2477_v40 = vpack.c.bf16 %v2413_v48, %v2413_v48  ;;  %v2479_v36 = vpack.c.bf16 %v2415_v51, %v2415_v51  ;;  %v6290_v51 = vld [vmem:[%s8287_s3 + $0x538] sm:$0xff]  }
 0x19f   :  { %5955 = vmatpush3.bf16.msra.mxu1 %v6255_v44  ;;  %5934 = vmatprep.subr.bf16.mxu0 %v6256_v46 }
 0x1a0   :  { %5956 = vmatprep.subr.bf16.mxu1 %v6257_v50 }
 0x1a2   :  { %5935 = vmatpush3.bf16.msra.mxu0 %v6258_v52  ;;  %v6291_v52 = vld [vmem:[%s8287_s3 + $0x5b8] sm:$0xff]  }
 0x1a3   :  { %5957 = vmatpush3.bf16.msra.mxu1 %v6259_v53  ;;  %5964 = vmatprep.subr.bf16.mxu0 %v6260_v54  ;;  %v6292_v53 = vld [vmem:[%s8287_s3 + $0x640] sm:$0xff]  }
 0x1a4   :  { %5986 = vmatprep.subr.bf16.mxu1 %v6261_v31  ;;  %v6293_v54 = vld [vmem:[%s8287_s3 + $0x6c0] sm:$0xff]  }
 0x1a5   :  { %4896 = vmatmul.mubr.bf16.vlgmr.msra.gmra.mrb[48].mxu0 %v2472_v33  ;;  %v6294_v31 = vld [vmem:[%s8287_s3 + $0x600] sm:$0xff]  }
 0x1a6   :  { %4936 = vmatmul.mubr.bf16.vlgmr.msra.gmra.mrb[48].mxu1 %v2474_v30  ;;  %5965 = vmatpush3.bf16.msra.mxu0 %v6262_v37  ;;  %v2476_v37 = vpack.c.bf16 %v7882_v38, %v7882_v38  ;;  %v6295_v33 = vld [vmem:[%s8287_s3 + $0x680] sm:$0xff]   ;;  %v6296_v30 = vld [vmem:[%s8287_s3 + $0x648] sm:$0xff]  }
 0x1a7   :  { %4975 = vmatprep.mubr.bf16.mxu0 %v2477_v40  ;;  %5987 = vmatpush3.bf16.msra.mxu1 %v6263_v56  ;;  %v2478_v56 = vpack.c.bf16 %v7890_v47, %v7890_v47  ;;  %v6297_v38 = vld [vmem:[%s8287_s3 + $0x6c8] sm:$0xff]  }
 0x1a8   :  { %5015 = vmatprep.mubr.bf16.mxu1 %v2479_v36  ;;  %5966 = vmatprep.subr.bf16.mxu0 %v6264_v32  ;;  %v6299_v47 = vld [vmem:[%s8287_s3 + $0x688] sm:$0xff]   ;;  %v6300_v36 = vld [vmem:[%s8287_s3 + $0x650] sm:$0xff]  }
 0x1a9   :  { %5988 = vmatprep.subr.bf16.mxu1 %v6265_v35  ;;  %v6298_v35 = vld [vmem:[%s8287_s3 + $0x608] sm:$0xff]  }
 0x1aa   :  { %5967 = vmatpush3.bf16.msra.mxu0 %v6266_v42  ;;  %v6301_v42 = vld [vmem:[%s8287_s3 + $0x6d0] sm:$0xff]  }
 0x1ab   :  { %5989 = vmatpush3.bf16.msra.mxu1 %v6267_v45  ;;  %5968 = vmatprep.subr.bf16.mxu0 %v6268_v11  ;;  %v6302_v45 = vld [vmem:[%s8287_s3 + $0x610] sm:$0xff]  }
 0x1ac   :  { %5990 = vmatprep.subr.bf16.mxu1 %v6269_v57  ;;  %v6303_v11 = vld [vmem:[%s8287_s3 + $0x690] sm:$0xff]   ;;  %v6304_v57 = vld [vmem:[%s8287_s3 + $0x658] sm:$0xff]  }
 0x1ae   :  { %5969 = vmatpush3.bf16.msra.mxu0 %v6270_v58  ;;  %v6305_v58 = vld [vmem:[%s8287_s3 + $0x6d8] sm:$0xff]  }
 0x1af   :  { %5991 = vmatpush3.bf16.msra.mxu1 %v6271_v61  ;;  %5970 = vmatprep.subr.bf16.mxu0 %v6272_v62  ;;  %v6306_v61 = vld [vmem:[%s8287_s3 + $0x618] sm:$0xff]  }
 0x1b0   :  { %5992 = vmatprep.subr.bf16.mxu1 %v6273_v0  ;;  %v6307_v62 = vld [vmem:[%s8287_s3 + $0x698] sm:$0xff]   ;;  %v6308_v0 = vld [vmem:[%s8287_s3 + $0x660] sm:$0xff]  }
 0x1b2   :  { %5971 = vmatpush3.bf16.msra.mxu0 %v6274_v1  ;;  %v6309_v1 = vld [vmem:[%s8287_s3 + $0x6e0] sm:$0xff]  }
 0x1b3   :  { %5993 = vmatpush3.bf16.msra.mxu1 %v6275_v3  ;;  %5972 = vmatprep.subr.bf16.mxu0 %v6276_v4  ;;  %v6310_v3 = vld [vmem:[%s8287_s3 + $0x620] sm:$0xff]  }
 0x1b4   :  { %5994 = vmatprep.subr.bf16.mxu1 %v6277_v6  ;;  %v6311_v4 = vld [vmem:[%s8287_s3 + $0x6a0] sm:$0xff]   ;;  %v6312_v6 = vld [vmem:[%s8287_s3 + $0x668] sm:$0xff]  }
 0x1b6   :  { %5973 = vmatpush3.bf16.msra.mxu0 %v6278_v14  ;;  %v6313_v14 = vld [vmem:[%s8287_s3 + $0x6e8] sm:$0xff]  }
 0x1b7   :  { %5995 = vmatpush3.bf16.msra.mxu1 %v6279_v49  ;;  %5974 = vmatprep.subr.bf16.mxu0 %v6280_v16  ;;  %v411_v49 = vrot.slane %v7967_v15, %v7373_v5  ;;  %v419_v16 = vrot.slane %v7967_v15, %v7379_v7  ;;  %v6315_v5 = vld [vmem:[%s8287_s3 + $0x6a8] sm:$0xff]   ;;  %v6316_v7 = vld [vmem:[%s8287_s3 + $0x670] sm:$0xff]  }
 0x1b8   :  { %v2262_v23 = vpop.f32.mrb[24].mxu0  ;;  %5996 = vmatprep.subr.bf16.mxu1 %v6281_v17  ;;  %v2303_v25 = vpop.f32.mrb[24].mxu1  ;;  %v415_v17 = vrot.slane %v7967_v15, %v7382_v9  ;;  %v6317_v9 = vld [vmem:[%s8287_s3 + $0x6f0] sm:$0xff]  }
 0x1b9   :  { %v2263_v24 = vadd.f32 %v2262_v23, %v395_v18  ;;  %v2264_v26 = vpop.f32.mrb[25].mxu0  ;;  %v2304_v27 = vadd.f32 %v2303_v25, %v403_v19  ;;  %v2305_v12 = vpop.f32.mrb[25].mxu1  ;;  %v6314_v18 = vld [vmem:[%s8287_s3 + $0x628] sm:$0xff]   ;;  %v423_v19 = vrot.slane %v7967_v15, %v7385_v10 }
 0x1ba   :  { %v2265_v2 = vadd.f32 %v2264_v26, %v399_v20  ;;  %v2266_v28 = vpop.f32.mrb[26].mxu0  ;;  %5975 = vmatpush3.bf16.msra.mxu0 %v6282_v21  ;;  %v2306_v59 = vadd.f32 %v2305_v12, %v407_v22  ;;  %v2307_v34 = vpop.f32.mrb[26].mxu1  ;;  %v6320_v12 = vld [vmem:[%s8287_s3 + $0x678] sm:$0xff]  }
 0x1bb   :  { %v8001_v29 = vmax.f32 %v2263_v24, 0.0  ;;  %5997 = vmatpush3.bf16.msra.mxu1 %v6283_v55  ;;  %v2267_v39 = vpop.f32.mrb[27].mxu0  ;;  %5976 = vmatprep.subr.bf16.mxu0 %v6284_v63  ;;  %v8009_v44 = vmax.f32 %v2304_v27, 0.0  ;;  %v2308_v48 = vpop.f32.mrb[27].mxu1  ;;  %v6321_v34 = vld [vmem:[%s8287_s3 + $0x6f8] sm:$0xff]  }
 0x1bc   :  { %v2417_v46 = vmax.f32 %v2265_v2, 0.0  ;;  %5998 = vmatprep.subr.bf16.mxu1 %v6285_v60  ;;  %v2419_v50 = vmax.f32 %v2306_v59, 0.0  ;;  %v6318_v60 = vld [vmem:[%s8287_s3 + $0x630] sm:$0xff]   ;;  %v6325_v48 = vld [vmem:[%s8287_s3 + $0x7c0] sm:$0xff]  }
 0x1bd   :  { %2448 = vst [vmem:[#allocation3 + $0xc0] sm:$0xff] %v8001_v29  ;;  %2450 = vst [vmem:[#allocation3 + $0xd0] sm:$0xff] %v8009_v44  ;;  %v6319_v2 = vld [vmem:[%s8287_s3 + $0x6b0] sm:$0xff]  }
 0x1be   :  { %2449 = vst [vmem:[#allocation3 + $0xc8] sm:$0xff] %v2417_v46  ;;  %5977 = vmatpush3.bf16.msra.mxu0 %v6286_v13  ;;  %2451 = vst [vmem:[#allocation3 + $0xd8] sm:$0xff] %v2419_v50  ;;  %v2481_v32 = vpack.c.bf16 %v2417_v46, %v2417_v46  ;;  %v2483_v40 = vpack.c.bf16 %v2419_v50, %v2419_v50  ;;  %v6324_v46 = vld [vmem:[%s8287_s3 + $0x740] sm:$0xff]   ;;  %v2480_v50 = vpack.c.bf16 %v8001_v29, %v8001_v29  ;;  %v6329_v29 = vld [vmem:[%s8287_s3 + $0x7c8] sm:$0xff]  }
 0x1bf   :  { %5999 = vmatpush3.bf16.msra.mxu1 %v6287_v41  ;;  %5978 = vmatprep.subr.bf16.mxu0 %v6288_v43  ;;  %v6322_v41 = vld [vmem:[%s8287_s3 + $0x638] sm:$0xff]  }
 0x1c0   :  { %6000 = vmatprep.subr.bf16.mxu1 %v6289_v8  ;;  %v6323_v43 = vld [vmem:[%s8287_s3 + $0x6b8] sm:$0xff]   ;;  %v6326_v8 = vld [vmem:[%s8287_s3 + $0x700] sm:$0xff]  }
 0x1c2   :  { %5979 = vmatpush3.bf16.msra.mxu0 %v6290_v51  ;;  %v6327_v51 = vld [vmem:[%s8287_s3 + $0x780] sm:$0xff]  }
 0x1c3   :  { %6001 = vmatpush3.bf16.msra.mxu1 %v6291_v52  ;;  %6008 = vmatprep.subr.bf16.mxu0 %v6292_v53  ;;  %v2482_v52 = vpack.c.bf16 %v8009_v44, %v8009_v44  ;;  %v6328_v53 = vld [vmem:[%s8287_s3 + $0x748] sm:$0xff]  }
 0x1c4   :  { %6030 = vmatprep.subr.bf16.mxu1 %v6293_v54  ;;  %v6331_v44 = vld [vmem:[%s8287_s3 + $0x788] sm:$0xff]  }
 0x1c5   :  { %4976 = vmatmul.mubr.bf16.vlgmr.msra.gmra.mrb[52].mxu0 %v2476_v37  ;;  %v6330_v37 = vld [vmem:[%s8287_s3 + $0x708] sm:$0xff]  }
 0x1c6   :  { %5016 = vmatmul.mubr.bf16.vlgmr.msra.gmra.mrb[52].mxu1 %v2478_v56  ;;  %6009 = vmatpush3.bf16.msra.mxu0 %v6294_v31  ;;  %v6333_v56 = vld [vmem:[%s8287_s3 + $0x7d0] sm:$0xff]  }
 0x1c7   :  { %5055 = vmatprep.mubr.bf16.mxu0 %v2481_v32  ;;  %6031 = vmatpush3.bf16.msra.mxu1 %v6295_v33  ;;  %v6332_v33 = vld [vmem:[%s8287_s3 + $0x750] sm:$0xff]  }
 0x1c8   :  { %5095 = vmatprep.mubr.bf16.mxu1 %v2483_v40  ;;  %6010 = vmatprep.subr.bf16.mxu0 %v6296_v30  ;;  %v6334_v30 = vld [vmem:[%s8287_s3 + $0x710] sm:$0xff]   ;;  %v6337_v40 = vld [vmem:[%s8287_s3 + $0x7d8] sm:$0xff]  }
 0x1c9   :  { %6032 = vmatprep.subr.bf16.mxu1 %v6297_v38  ;;  %v6335_v32 = vld [vmem:[%s8287_s3 + $0x790] sm:$0xff]   ;;  %v6336_v38 = vld [vmem:[%s8287_s3 + $0x758] sm:$0xff]  }
 0x1ca   :  { %6011 = vmatpush3.bf16.msra.mxu0 %v6298_v35  ;;  %v6338_v35 = vld [vmem:[%s8287_s3 + $0x718] sm:$0xff]  }
 0x1cb   :  { %6033 = vmatpush3.bf16.msra.mxu1 %v6299_v47  ;;  %6012 = vmatprep.subr.bf16.mxu0 %v6300_v36  ;;  %v6339_v47 = vld [vmem:[%s8287_s3 + $0x798] sm:$0xff]   ;;  %v6340_v36 = vld [vmem:[%s8287_s3 + $0x760] sm:$0xff]  }
 0x1cc   :  { %6034 = vmatprep.subr.bf16.mxu1 %v6301_v42  ;;  %v6341_v42 = vld [vmem:[%s8287_s3 + $0x7e0] sm:$0xff]  }
 0x1ce   :  { %6013 = vmatpush3.bf16.msra.mxu0 %v6302_v45  ;;  %v6342_v45 = vld [vmem:[%s8287_s3 + $0x720] sm:$0xff]  }
 0x1cf   :  { %6035 = vmatpush3.bf16.msra.mxu1 %v6303_v11  ;;  %6014 = vmatprep.subr.bf16.mxu0 %v6304_v57  ;;  %v6343_v11 = vld [vmem:[%s8287_s3 + $0x7a0] sm:$0xff]   ;;  %v6344_v57 = vld [vmem:[%s8287_s3 + $0x768] sm:$0xff]  }
 0x1d0   :  { %6036 = vmatprep.subr.bf16.mxu1 %v6305_v58  ;;  %v6345_v58 = vld [vmem:[%s8287_s3 + $0x7e8] sm:$0xff]  }
 0x1d2   :  { %6015 = vmatpush3.bf16.msra.mxu0 %v6306_v61  ;;  %v6346_v61 = vld [vmem:[%s8287_s3 + $0x728] sm:$0xff]  }
 0x1d3   :  { %6037 = vmatpush3.bf16.msra.mxu1 %v6307_v62  ;;  %6016 = vmatprep.subr.bf16.mxu0 %v6308_v0  ;;  %v6347_v62 = vld [vmem:[%s8287_s3 + $0x7a8] sm:$0xff]   ;;  %v6348_v0 = vld [vmem:[%s8287_s3 + $0x770] sm:$0xff]  }
 0x1d4   :  { %6038 = vmatprep.subr.bf16.mxu1 %v6309_v1 }
 0x1d6   :  { %6017 = vmatpush3.bf16.msra.mxu0 %v6310_v3  ;;  %v6349_v3 = vld [vmem:[%s8287_s3 + $0x7f0] sm:$0xff]  }
 0x1d7   :  { %6039 = vmatpush3.bf16.msra.mxu1 %v6311_v4  ;;  %6018 = vmatprep.subr.bf16.mxu0 %v6312_v6  ;;  %v5487_v6 = vld [vmem:[%s8288_s4] ss:$0 sm:$0xff] }
 0x1d8   :  { %v2344_v20 = vpop.f32.mrb[28].mxu0  ;;  %6040 = vmatprep.subr.bf16.mxu1 %v6313_v14  ;;  %v2385_v22 = vpop.f32.mrb[28].mxu1 }
 0x1d9   :  { %v2345_v21 = vadd.f32 %v2344_v20, %v411_v49  ;;  %v2346_v55 = vpop.f32.mrb[29].mxu0  ;;  %v2386_v63 = vadd.f32 %v2385_v22, %v419_v16  ;;  %v2387_v15 = vpop.f32.mrb[29].mxu1  ;;  %v6351_v20 = vld [vmem:[%s8287_s3 + $0x7b0] sm:$0xff]  }
 0x1da   :  { %v2347_v10 = vadd.f32 %v2346_v55, %v415_v17  ;;  %v2348_v23 = vpop.f32.mrb[30].mxu0  ;;  %6019 = vmatpush3.bf16.msra.mxu0 %v6314_v18  ;;  %v2388_v25 = vadd.f32 %v2387_v15, %v423_v19  ;;  %v2389_v26 = vpop.f32.mrb[30].mxu1  ;;  %v6350_v18 = vld [vmem:[%s8287_s3 + $0x730] sm:$0xff]   ;;  %v6353_v55 = vld [vmem:[%s8287_s3 + $0x7f8] sm:$0xff]  }
 0x1db   :  { %v8115_v24 = vmax.f32 %v2345_v21, 0.0  ;;  %6041 = vmatpush3.bf16.msra.mxu1 %v6315_v5  ;;  %v2349_v27 = vpop.f32.mrb[31].mxu0  ;;  %6020 = vmatprep.subr.bf16.mxu0 %v6316_v7  ;;  %v8123_v28 = vmax.f32 %v2386_v63, 0.0  ;;  %v2390_v59 = vpop.f32.mrb[31].mxu1  ;;  %v6355_v15 = vld [vmem:[%s8287_s3 + $0x7b8] sm:$0xff]  }
 0x1dc   :  { %v2421_v13 = vmax.f32 %v2347_v10, 0.0  ;;  %6042 = vmatprep.subr.bf16.mxu1 %v6317_v9  ;;  %v2423_v39 = vmax.f32 %v2388_v25, 0.0  ;;  %v6352_v9 = vld [vmem:[%s8287_s3 + $0x778] sm:$0xff]  }
 0x1dd   :  { %2452 = vst [vmem:[#allocation3 + $0xe0] sm:$0xff] %v8115_v24  ;;  %2454 = vst [vmem:[#allocation3 + $0xf0] sm:$0xff] %v8123_v28  ;;  %v6354_v10 = vld [vmem:[%s8287_s3 + $0x738] sm:$0xff]   ;;  %v2484_v23 = vpack.c.bf16 %v8115_v24, %v8115_v24  ;;  %s6429_s3 = smov [#allocation3]  }
 0x1de   :  { %2453 = vst [vmem:[#allocation3 + $0xe8] sm:$0xff] %v2421_v13  ;;  %6021 = vmatpush3.bf16.msra.mxu0 %v6318_v60  ;;  %2455 = vst [vmem:[#allocation3 + $0xf8] sm:$0xff] %v2423_v39  ;;  %v2485_v54 = vpack.c.bf16 %v2421_v13, %v2421_v13  ;;  %v2487_v31 = vpack.c.bf16 %v2423_v39, %v2423_v39  ;;  %v2486_v60 = vpack.c.bf16 %v8123_v28, %v8123_v28  ;;  %s5196_s25 = sshll.u32 %s6429_s3, 4  ;;  %s5197_s25 = int_to_ptr.vmem [resolvable:$true] %s5196_s25 }
 0x1df   :  { %6043 = vmatpush3.bf16.msra.mxu1 %v6319_v2  ;;  %6022 = vmatprep.subr.bf16.mxu0 %v6320_v12  ;;  %s6358_s2 = scalar_lea.vmem %s5197_s25, 4096  ;;  %p6363_p1 = scmp.lt.s32.totalorder %s5197_s25, %s5197_s25 }
 0x1e0   :  { %6044 = vmatprep.subr.bf16.mxu1 %v6321_v34  ;;  %p6359_p0 = scmp.ne.s32.totalorder %s5197_s25, %s6358_s2  ;;  %p6364_p2 = scmp.lt.s32.totalorder %s6358_s2, %s6358_s2 }
 0x1e2   :  { %6023 = vmatpush3.bf16.msra.mxu0 %v6322_v41  ;;  %p6365_p3 = por %p6364_p2, %p6363_p1 }
 0x1e3   :  { %6045 = vmatpush3.bf16.msra.mxu1 %v6323_v43  ;;  %6052 = vmatprep.subr.bf16.mxu0 %v6324_v46 }
 0x1e4   :  { %6074 = vmatprep.subr.bf16.mxu1 %v6325_v48  ;;  %p6366_p4 = pnand %p6365_p3, %p6359_p0 }
 0x1e5   :  { %5056 = vmatmul.mubr.bf16.vlgmr.msra.gmra.mrb[56].mxu0 %v2480_v50 }
 0x1e6   :  { %5096 = vmatmul.mubr.bf16.vlgmr.msra.gmra.mrb[56].mxu1 %v2482_v52  ;;  %6053 = vmatpush3.bf16.msra.mxu0 %v6326_v8 }
 0x1e7   :  { %5135 = vmatprep.mubr.bf16.mxu0 %v2485_v54  ;;  %6075 = vmatpush3.bf16.msra.mxu1 %v6327_v51 }
 0x1e8   :  { %5175 = vmatprep.mubr.bf16.mxu1 %v2487_v31  ;;  %6054 = vmatprep.subr.bf16.mxu0 %v6328_v53 }
 0x1e9   :  { %6076 = vmatprep.subr.bf16.mxu1 %v6329_v29 }
 0x1ea   :  { %6055 = vmatpush3.bf16.msra.mxu0 %v6330_v37 }
 0x1eb   :  { %6077 = vmatpush3.bf16.msra.mxu1 %v6331_v44  ;;  %6056 = vmatprep.subr.bf16.mxu0 %v6332_v33 }
 0x1ec   :  { %6078 = vmatprep.subr.bf16.mxu1 %v6333_v56 }
 0x1ee   :  { %6057 = vmatpush3.bf16.msra.mxu0 %v6334_v30 }
 0x1ef   :  { %6079 = vmatpush3.bf16.msra.mxu1 %v6335_v32  ;;  %6058 = vmatprep.subr.bf16.mxu0 %v6336_v38 }
 0x1f0   :  { %6080 = vmatprep.subr.bf16.mxu1 %v6337_v40 }
 0x1f2   :  { %6059 = vmatpush3.bf16.msra.mxu0 %v6338_v35 }
 0x1f3   :  { %6081 = vmatpush3.bf16.msra.mxu1 %v6339_v47  ;;  %6060 = vmatprep.subr.bf16.mxu0 %v6340_v36 }
 0x1f4   :  { %6082 = vmatprep.subr.bf16.mxu1 %v6341_v42 }
 0x1f6   :  { %6061 = vmatpush3.bf16.msra.mxu0 %v6342_v45 }
 0x1f7   :  { %6083 = vmatpush3.bf16.msra.mxu1 %v6343_v11  ;;  %6062 = vmatprep.subr.bf16.mxu0 %v6344_v57 }
 0x1f8   :  { %v5760_v1 = vpop.f32.mrb[32].mxu0  ;;  %6084 = vmatprep.subr.bf16.mxu1 %v6345_v58 }
 0x1f9   :  { %v5782_v4 = vpop.f32.mrb[32].mxu1  ;;  %v5761_v14 = vpop.f32.mrb[33].mxu0 }
 0x1fa   :  { %v5762_v49 = vadd.f32 %v5761_v14, %v5760_v1  ;;  %v5783_v16 = vpop.f32.mrb[33].mxu1  ;;  %v5763_v17 = vpop.f32.mrb[34].mxu0  ;;  %6063 = vmatpush3.bf16.msra.mxu0 %v6346_v61 }
 0x1fb   :  { %v5784_v19 = vadd.f32 %v5783_v16, %v5782_v4  ;;  %v5785_v5 = vpop.f32.mrb[34].mxu1  ;;  %6085 = vmatpush3.bf16.msra.mxu1 %v6347_v62  ;;  %v5764_v7 = vpop.f32.mrb[35].mxu0  ;;  %6064 = vmatprep.subr.bf16.mxu0 %v6348_v0 }
 0x1fc   :  { %v4578_v21 = vadd.f32 %v5762_v49, %v5487_v6  ;;  %v5786_v22 = vpop.f32.mrb[35].mxu1  ;;  %6086 = vmatprep.subr.bf16.mxu1 %v6349_v3 }
 0x1fe   :  { %v4618_v63 = vadd.f32 %v5784_v19, %v4578_v21  ;;  %6065 = vmatpush3.bf16.msra.mxu0 %v6350_v18 }
 0x1ff   :  { %6087 = vmatpush3.bf16.msra.mxu1 %v6351_v20  ;;  %6066 = vmatprep.subr.bf16.mxu0 %v6352_v9 }
 0x200   :  { %6088 = vmatprep.subr.bf16.mxu1 %v6353_v55 }
 0x202   :  { %6067 = vmatpush3.bf16.msra.mxu0 %v6354_v10 }
 0x203   :  { %6089 = vmatpush3.bf16.msra.mxu1 %v6355_v15 }
 0x205   :  { %5136 = vmatmul.mubr.bf16.vlgmr.msra.gmra.mrb[60].mxu0 %v2484_v23 }
 0x206   :  { %5176 = vmatmul.mubr.bf16.vlgmr.msra.gmra.mrb[60].mxu1 %v2486_v60 }
 0x218   :  { %v5804_v25 = vpop.f32.mrb[36].mxu0 }
 0x219   :  { %v5826_v26 = vpop.f32.mrb[36].mxu1  ;;  %v5805_v27 = vpop.f32.mrb[37].mxu0 }
 0x21a   :  { %v5806_v2 = vadd.f32 %v5805_v27, %v5804_v25  ;;  %v5827_v12 = vpop.f32.mrb[37].mxu1  ;;  %v5807_v13 = vpop.f32.mrb[38].mxu0 }
 0x21b   :  { %v5828_v59 = vadd.f32 %v5827_v12, %v5826_v26  ;;  %v5829_v34 = vpop.f32.mrb[38].mxu1  ;;  %v5808_v39 = vpop.f32.mrb[39].mxu0 }
 0x21c   :  { %v4658_v41 = vadd.f32 %v5806_v2, %v4618_v63  ;;  %v5830_v43 = vpop.f32.mrb[39].mxu1 }
 0x21e   :  { %v4698_v46 = vadd.f32 %v5828_v59, %v4658_v41 }
 0x238   :  { %v5848_v48 = vpop.f32.mrb[40].mxu0 }
 0x239   :  { %v5870_v24 = vpop.f32.mrb[40].mxu1  ;;  %v5849_v8 = vpop.f32.mrb[41].mxu0 }
 0x23a   :  { %v5850_v50 = vadd.f32 %v5849_v8, %v5848_v48  ;;  %v5871_v51 = vpop.f32.mrb[41].mxu1  ;;  %v5851_v28 = vpop.f32.mrb[42].mxu0 }
 0x23b   :  { %v5872_v52 = vadd.f32 %v5871_v51, %v5870_v24  ;;  %v5873_v53 = vpop.f32.mrb[42].mxu1  ;;  %v5852_v54 = vpop.f32.mrb[43].mxu0 }
 0x23c   :  { %v4738_v29 = vadd.f32 %v5850_v50, %v4698_v46  ;;  %v5874_v31 = vpop.f32.mrb[43].mxu1 }
 0x23e   :  { %v4778_v37 = vadd.f32 %v5872_v52, %v4738_v29 }
 0x258   :  { %v5892_v44 = vpop.f32.mrb[44].mxu0 }
 0x259   :  { %v5914_v33 = vpop.f32.mrb[44].mxu1  ;;  %v5893_v56 = vpop.f32.mrb[45].mxu0 }
 0x25a   :  { %v5894_v30 = vadd.f32 %v5893_v56, %v5892_v44  ;;  %v5915_v32 = vpop.f32.mrb[45].mxu1  ;;  %v5895_v38 = vpop.f32.mrb[46].mxu0 }
 0x25b   :  { %v5916_v40 = vadd.f32 %v5915_v32, %v5914_v33  ;;  %v5917_v35 = vpop.f32.mrb[46].mxu1  ;;  %v5896_v47 = vpop.f32.mrb[47].mxu0 }
 0x25c   :  { %v4818_v36 = vadd.f32 %v5894_v30, %v4778_v37  ;;  %v5918_v42 = vpop.f32.mrb[47].mxu1 }
 0x25e   :  { %v4858_v45 = vadd.f32 %v5916_v40, %v4818_v36 }
 0x25f   :  { %6369 = shalt.err (!%p6366_p4)
}
 0x260   :  { %s6370_s28 = scalar_lea.hbm %s8290_s6, 4096 }
 0x261   :  { %p6371_p5 = scmp.ne.s32.totalorder %s8290_s6, %s6370_s28  ;;  %p6374_p6 = scmp.lt.u32.totalorder %s6370_s28, %s8290_s6 }
 0x263   :  { %p6376_p7 = pnand %p6374_p6, %p6371_p5 }
 0x265   :  { %6379 = shalt.err (!%p6376_p7)
}
 0x266   :  { %5199 = dma.vmem_to_hbm [thread:$0]  %s5197_s25, 4096, %s8290_s6, [#allocation4]   ;;  %v5186_v53 = vstv %s8289_s5  ;;  %vm5183_vm0 = vcmask 523264  }
 0x267   :  { %s6430_s6 = smov [#allocation5]  }
 0x268   :  { %s5206_s13 = sshll.u32 %s6430_s6, 4  ;;  %s5207_s13 = int_to_ptr.vmem [resolvable:$true] %s5206_s13 }
 0x269   :  { %s6380_s16 = scalar_lea.vmem %s5207_s13, 128  ;;  %p6385_p9 = scmp.lt.s32.totalorder %s5207_s13, %s5207_s13 }
 0x26a   :  { %p6381_p8 = scmp.ne.s32.totalorder %s5207_s13, %s6380_s16  ;;  %p6386_p10 = scmp.lt.s32.totalorder %s6380_s16, %s6380_s16 }
 0x26c   :  { %p6387_p11 = por %p6386_p10, %p6385_p9 }
 0x26e   :  { %p6388_p12 = pnand %p6387_p11, %p6381_p8 }
 0x278   :  { %v5936_v11 = vpop.f32.mrb[48].mxu0 }
 0x279   :  { %v5958_v57 = vpop.f32.mrb[48].mxu1  ;;  %v5937_v58 = vpop.f32.mrb[49].mxu0 }
 0x27a   :  { %v5938_v61 = vadd.f32 %v5937_v58, %v5936_v11  ;;  %v5959_v62 = vpop.f32.mrb[49].mxu1  ;;  %v5939_v0 = vpop.f32.mrb[50].mxu0 }
 0x27b   :  { %v5960_v1 = vadd.f32 %v5959_v62, %v5958_v57  ;;  %v5961_v3 = vpop.f32.mrb[50].mxu1  ;;  %v5940_v4 = vpop.f32.mrb[51].mxu0 }
 0x27c   :  { %v4898_v6 = vadd.f32 %v5938_v61, %v4858_v45  ;;  %v5962_v14 = vpop.f32.mrb[51].mxu1 }
 0x27e   :  { %v4938_v49 = vadd.f32 %v5960_v1, %v4898_v6 }
 0x298   :  { %v5980_v16 = vpop.f32.mrb[52].mxu0 }
 0x299   :  { %v6002_v17 = vpop.f32.mrb[52].mxu1  ;;  %v5981_v18 = vpop.f32.mrb[53].mxu0 }
 0x29a   :  { %v5982_v19 = vadd.f32 %v5981_v18, %v5980_v16  ;;  %v6003_v5 = vpop.f32.mrb[53].mxu1  ;;  %v5983_v7 = vpop.f32.mrb[54].mxu0 }
 0x29b   :  { %v6004_v20 = vadd.f32 %v6003_v5, %v6002_v17  ;;  %v6005_v9 = vpop.f32.mrb[54].mxu1  ;;  %v5984_v21 = vpop.f32.mrb[55].mxu0 }
 0x29c   :  { %v4978_v22 = vadd.f32 %v5982_v19, %v4938_v49  ;;  %v6006_v55 = vpop.f32.mrb[55].mxu1 }
 0x29e   :  { %v5018_v63 = vadd.f32 %v6004_v20, %v4978_v22 }
 0x2b8   :  { %v6024_v10 = vpop.f32.mrb[56].mxu0 }
 0x2b9   :  { %v6046_v15 = vpop.f32.mrb[56].mxu1  ;;  %v6025_v23 = vpop.f32.mrb[57].mxu0 }
 0x2ba   :  { %v6026_v60 = vadd.f32 %v6025_v23, %v6024_v10  ;;  %v6047_v25 = vpop.f32.mrb[57].mxu1  ;;  %v6027_v26 = vpop.f32.mrb[58].mxu0 }
 0x2bb   :  { %v6048_v27 = vadd.f32 %v6047_v25, %v6046_v15  ;;  %v6049_v2 = vpop.f32.mrb[58].mxu1  ;;  %v6028_v12 = vpop.f32.mrb[59].mxu0 }
 0x2bc   :  { %v5058_v13 = vadd.f32 %v6026_v60, %v5018_v63  ;;  %v6050_v59 = vpop.f32.mrb[59].mxu1 }
 0x2be   :  { %v5098_v34 = vadd.f32 %v6048_v27, %v5058_v13 }
 0x2d8   :  { %v6068_v39 = vpop.f32.mrb[60].mxu0 }
 0x2d9   :  { %v6090_v41 = vpop.f32.mrb[60].mxu1  ;;  %v6069_v43 = vpop.f32.mrb[61].mxu0 }
 0x2da   :  { %v6070_v46 = vadd.f32 %v6069_v43, %v6068_v39  ;;  %v6091_v48 = vpop.f32.mrb[61].mxu1  ;;  %v6071_v24 = vpop.f32.mrb[62].mxu0 }
 0x2db   :  { %v6092_v8 = vadd.f32 %v6091_v48, %v6090_v41  ;;  %v6093_v50 = vpop.f32.mrb[62].mxu1  ;;  %v6072_v51 = vpop.f32.mrb[63].mxu0 }
 0x2dc   :  { %v5138_v28 = vadd.f32 %v6070_v46, %v5098_v34  ;;  %v6094_v52 = vpop.f32.mrb[63].mxu1 }
 0x2de   :  { %v5178_v54 = vadd.f32 %v6092_v8, %v5138_v28 }
 0x2e0   :  { %v5187_v29 = vmul.f32 %v5186_v53, %v5178_v54  ;;  %5184 = vst.msk [vmem:[#allocation5] sm:$0xff] %vm5183_vm0, %v5178_v54 }
 0x2e1   :  { %6391 = shalt.err (!%p6388_p12)
}
 0x2e2   :  { %s6392_s18 = scalar_lea.hbm %s8291_s7, 128 }
 0x2e3   :  { %p6393_p13 = scmp.ne.s32.totalorder %s8291_s7, %s6392_s18  ;;  %p6396_p0 = scmp.lt.u32.totalorder %s6392_s18, %s8291_s7 }
 0x2e5   :  { %p6398_p1 = pnand %p6396_p0, %p6393_p13 }
 0x2e7   :  { %6401 = shalt.err (!%p6398_p1)
}
 0x2e8   :  { %5209 = dma.vmem_to_hbm [thread:$0]  %s5207_s13, 128, %s8291_s7, [#allocation6]   ;;  %6356 = vtanh.f32 %v5187_v29 }
 0x2e9   :  { %s6431_s22 = smov [#allocation7]  }
 0x2ea   :  { %s5216_s23 = sshll.u32 %s6431_s22, 4  ;;  %s5217_s23 = int_to_ptr.vmem [resolvable:$true] %s5216_s23 }
 0x2eb   :  { %s6402_s24 = scalar_lea.vmem %s5217_s23, 128  ;;  %p6407_p3 = scmp.lt.s32.totalorder %s5217_s23, %s5217_s23 }
 0x2ec   :  { %p6403_p2 = scmp.ne.s32.totalorder %s5217_s23, %s6402_s24  ;;  %p6408_p4 = scmp.lt.s32.totalorder %s6402_s24, %s6402_s24 }
 0x2ee   :  { %p6409_p5 = por %p6408_p4, %p6407_p3 }
 0x2f0   :  { %p6410_p6 = pnand %p6409_p5, %p6403_p2 }
 0x2f2   :  { %v6357_v31 = vpop.eup %6356 }
 0x2f3   :  { %5189 = vst.msk [vmem:[#allocation7] sm:$0xff] %vm5183_vm0, %v6357_v31 }
 0x2f4   :  { %6413 = shalt.err (!%p6410_p6)
}
 0x2f5   :  { %s6414_s2 = scalar_lea.hbm %s8292_s8, 128 }
 0x2f6   :  { %p6415_p7 = scmp.ne.s32.totalorder %s8292_s8, %s6414_s2  ;;  %p6418_p8 = scmp.lt.u32.totalorder %s6414_s2, %s8292_s8 }
 0x2f8   :  { %p6420_p9 = pnand %p6418_p8, %p6415_p7 }
 0x2fa   :  { %6423 = shalt.err (!%p6420_p9)
}
 0x2fb   :  { %5219 = dma.vmem_to_hbm [thread:$0]  %s5217_s23, 128, %s8292_s8, [#allocation6]  }
 0x2fc   :  { %6424 = dma.done.wait [#allocation4], 4096  }
 0x2fd   :  { %6425 = vsyncadd [#allocation4], 4294963200 }
 0x2fe   :  { %6426 = dma.done.wait [#allocation6], 256  }
 0x2ff   :  { %6427 = vsyncadd [#allocation6], 4294967040 }
 0x300   :  { %5229 = vsyncpa [#allocation4], 1 }
 0x301   :  { %5230 = vsyncpa [#allocation6], 1 }

</bundles_post_ra>
